<compile_context>
chip_gen: v7x
topology: tpu7x:2x2x1
jax: 0.10.0
libtpu: 0.0.40
codegen_flags: <defaults>
</compile_context>

<pallas_src>
import jax
import jax.numpy as jnp
from jax import lax
from jax.experimental import pallas as pl
from jax.experimental.pallas import tpu as pltpu

# ---- problem sizes (small, consistent with a 2D registration forward) ----
B = 2            # batch
C_EACH = 1       # channels of moving / fixed image
H = W = 16       # spatial
C_IN = 2 * C_EACH    # after cat((moving, fixed), dim=1)
C_MID = 16           # surrogate hidden width
C_OUT = 2            # 2-D displacement (dy, dx) per pixel
K = 3                # conv kernel size

WP = W + 2                  # padded row width per batch element (18)
ROW = B * WP                # lane stride of one padded image row, batch folded in (36)
L = H * ROW                 # matmul N / output lanes (576)
NE = (H + 2) * ROW + 2      # flat padded image length + tail slack for last tap (650)
PAD_OFF = ROW + 1           # lane offset of pixel (h=0, b=0, w=0) in padded layout (37)

K1 = K * K * C_IN + 1       # conv1 im2col rows + ones row for fused bias (19)
K2 = K * K * C_MID + 1      # conv2 im2col rows + ones row for fused bias (145)


def _transmorph_kernel(xe_ref, w1_ref, w2_ref, out_ref, a1_ref, h1p_ref, a2_ref):
    """Single invocation; both batch elements ride the lane axis.

    xe_ref  : (C_IN, NE)   pre-concatenated, pre-zero-padded input (batch-in-row layout)
    w1_ref  : (C_MID, K1)  conv1 weights, im2col-flattened + fused bias column
    w2_ref  : (C_OUT, K2)  conv2 weights, im2col-flattened + fused bias column
    out_ref : (C_OUT, L)   displacement, lane-dense (junk pad columns cropped host-side)
    a1_ref  : (K1, L)      VMEM scratch: conv1 im2col matrix (+ ones row)
    h1p_ref : (C_MID, NE)  VMEM scratch: zero-padded conv1 activations
    a2_ref  : (K2, L)      VMEM scratch: conv2 im2col matrix (+ ones row)
    """
    ones_row = jnp.ones((1, L), jnp.float32)

    # conv1 im2col: every 3x3 tap is a contiguous lane slice of the pre-padded
    # input (pad columns are real zeros -> no edge masks), written to scratch at
    # fixed row offsets instead of concatenates.
    for t in range(K * K):
        dy, dx = divmod(t, K)
        off = dy * ROW + dx
        a1_ref[t * C_IN:(t + 1) * C_IN, :] = xe_ref[:, off:off + L]
    a1_ref[K * K * C_IN:K1, :] = ones_row                 # fused-bias ones row

    # conv1 (3x3 SAME) as ONE MXU matmul over both batches; bias fused; ReLU.
    h1 = jnp.maximum(
        jnp.dot(w1_ref[...], a1_ref[...], preferred_element_type=jnp.float32), 0.0)

    # Re-pad conv1's output for conv2: one junk-column mask + one placement into a
    # pre-zeroed scratch reproduces SAME zero padding exactly.
    lane = lax.broadcasted_iota(jnp.int32, (1, L), 1)
    valid = (lane % WP < W).astype(jnp.float32)           # kill 2 junk cols per sub-row
    h1p_ref[...] = jnp.zeros_like(h1p_ref)
    h1p_ref[:, PAD_OFF:PAD_OFF + L] = h1 * valid

    # conv2 im2col: 16-row slabs land at 8-aligned sublane offsets.
    for t in range(K * K):
        dy, dx = divmod(t, K)
        off = dy * ROW + dx
        a2_ref[t * C_MID:(t + 1) * C_MID, :] = h1p_ref[:, off:off + L]
    a2_ref[K * K * C_MID:K2, :] = ones_row

    # conv2 as ONE MXU matmul; single lane-dense output store.
    out_ref[...] = jnp.dot(w2_ref[...], a2_ref[...],
                           preferred_element_type=jnp.float32).astype(out_ref.dtype)


def transmorph_forward(moving, fixed, params):
    """moving, fixed: NCHW f32 (B, C_EACH, H, W) -> displacement NCHW (B, C_OUT, H, W)."""
    w1, b1, w2, b2 = params

    # --- host-side layout prep only (no conv math) ---
    # torch.cat(dim=1) + SAME zero padding, with the batch folded INSIDE each padded
    # row: flat index = row*ROW + b*WP + col, so every 3x3 tap in the kernel is one
    # contiguous lane slice covering both batch elements at once.
    x = jnp.concatenate([moving, fixed], axis=1)                    # (B, C_IN, H, W)
    xp = jnp.pad(x, ((0, 0), (0, 0), (1, 1), (1, 1)))               # (B, C_IN, H+2, WP)
    xe = jnp.transpose(xp, (1, 2, 0, 3)).reshape(C_IN, (H + 2) * ROW)
    xe = jnp.pad(xe, ((0, 0), (0, NE - (H + 2) * ROW)))             # (C_IN, NE)

    # im2col-flattened, transposed weights with the bias fused as an extra column
    # (matches the in-kernel ones row).
    w1a = jnp.concatenate([w1.reshape(K * K * C_IN, C_MID).T,
                           b1.reshape(C_MID, 1)], axis=1)           # (C_MID, K1)
    w2a = jnp.concatenate([w2.reshape(K * K * C_MID, C_OUT).T,
                           b2.reshape(C_OUT, 1)], axis=1)           # (C_OUT, K2)

    out_flat = pl.pallas_call(
        _transmorph_kernel,
        out_shape=jax.ShapeDtypeStruct((C_OUT, L), jnp.float32),
        # Whole arrays resident in VMEM, no grid: single invocation, weights and
        # inputs DMA'd exactly once (total footprint << VMEM on v5e/v6e/v7x).
        in_specs=[pl.BlockSpec(memory_space=pltpu.MemorySpace.VMEM)] * 3,
        out_specs=pl.BlockSpec(memory_space=pltpu.MemorySpace.VMEM),
        scratch_shapes=[
            pltpu.VMEM((K1, L), jnp.float32),       # conv1 im2col matrix
            pltpu.VMEM((C_MID, NE), jnp.float32),   # zero-padded conv1 activations
            pltpu.VMEM((K2, L), jnp.float32),       # conv2 im2col matrix
        ],
    )(xe, w1a, w2a)

    # lane q = h*ROW + b*WP + w  ->  crop the 2 junk pad columns, back to NCHW.
    out = out_flat.reshape(C_OUT, H, B, WP)[:, :, :, :W]
    return jnp.transpose(out, (2, 0, 1, 3))                         # (B, C_OUT, H, W)


def reference_forward(moving, fixed, params):
    """Pure-JAX reference (lax.conv, HIGHEST precision) with identical semantics."""
    w1, b1, w2, b2 = params
    x = jnp.concatenate([moving, fixed], axis=1)          # torch.cat(dim=1)
    x = jnp.transpose(x, (0, 2, 3, 1))                    # NHWC
    dn = ("NHWC", "HWIO", "NHWC")
    hp = lax.Precision.HIGHEST
    h = lax.conv_general_dilated(x, w1, (1, 1), "SAME", dimension_numbers=dn,
                                 precision=hp)
    h = jnp.maximum(h + b1.reshape(1, 1, 1, C_MID), 0.0)
    o = lax.conv_general_dilated(h, w2, (1, 1), "SAME", dimension_numbers=dn,
                                 precision=hp)
    o = o + b2.reshape(1, 1, 1, C_OUT)
    return jnp.transpose(o, (0, 3, 1, 2))                 # NCHW


def init_params(key):
    k1, k2 = jax.random.split(key)
    w1 = 0.1 * jax.random.normal(k1, (K, K, C_IN, C_MID), jnp.float32)
    b1 = jnp.full((C_MID,), 0.01, jnp.float32)
    w2 = 0.1 * jax.random.normal(k2, (K, K, C_MID, C_OUT), jnp.float32)
    b2 = 0.01 * jnp.arange(1, C_OUT + 1, dtype=jnp.float32)
    return (w1, b1, w2, b2)


if __name__ == "__main__":
    key = jax.random.PRNGKey(0)
    k_m, k_f, k_p = jax.random.split(key, 3)
    moving = jax.random.normal(k_m, (B, C_EACH, H, W), jnp.float32)
    fixed = jax.random.normal(k_f, (B, C_EACH, H, W), jnp.float32)
    params = init_params(k_p)

    dsp = transmorph_forward(moving, fixed, params)
    dsp = jax.block_until_ready(dsp)

    ref = jax.block_until_ready(reference_forward(moving, fixed, params))
    assert dsp.shape == (B, C_OUT, H, W), dsp.shape
    max_err = float(jnp.max(jnp.abs(dsp - ref)))
    assert jnp.allclose(dsp, ref, atol=1e-5, rtol=1e-4), max_err

    print("KERNEL_OK")
</pallas_src>

<mosaic_0001>
module attributes {stable_mosaic.version = 11 : i64} {
  func.func @_transmorph_kernel(%arg0: memref<2x650xf32, #tpu.memory_space<vmem>>, %arg1: memref<16x19xf32, #tpu.memory_space<vmem>>, %arg2: memref<2x145xf32, #tpu.memory_space<vmem>>, %arg3: memref<2x576xf32, #tpu.memory_space<vmem>>, %arg4: memref<19x576xf32, #tpu.memory_space<vmem>>, %arg5: memref<16x650xf32, #tpu.memory_space<vmem>>, %arg6: memref<145x576xf32, #tpu.memory_space<vmem>>) attributes {dimension_semantics = [], scalar_prefetch = 0 : i64, scratch_operands = 3 : i64, tpu.core_type = #tpu.core_type<tc>} {
    %cst = arith.constant 1.000000e+00 : f32
    %0 = vector.broadcast %cst : f32 to vector<1x576xf32>
    %c0 = arith.constant 0 : index
    %c0_0 = arith.constant 0 : index
    %1 = vector.load %arg0[%c0, %c0_0] : memref<2x650xf32, #tpu.memory_space<vmem>>, vector<2x576xf32>
    %c0_1 = arith.constant 0 : index
    %c0_2 = arith.constant 0 : index
    %2 = vector.load %arg4[%c0_1, %c0_2] : memref<19x576xf32, #tpu.memory_space<vmem>>, vector<2x576xf32>
    tpu.vector_store %arg4[%c0_1, %c0_2], %1 {strides = array<i32>} : memref<19x576xf32, #tpu.memory_space<vmem>>, vector<2x576xf32>,
    %c0_3 = arith.constant 0 : index
    %c1 = arith.constant 1 : index
    %3 = vector.load %arg0[%c0_3, %c1] : memref<2x650xf32, #tpu.memory_space<vmem>>, vector<2x576xf32>
    %c2 = arith.constant 2 : index
    %c0_4 = arith.constant 0 : index
    %4 = vector.load %arg4[%c2, %c0_4] : memref<19x576xf32, #tpu.memory_space<vmem>>, vector<2x576xf32>
    tpu.vector_store %arg4[%c2, %c0_4], %3 {strides = array<i32>} : memref<19x576xf32, #tpu.memory_space<vmem>>, vector<2x576xf32>,
    %c0_5 = arith.constant 0 : index
    %c2_6 = arith.constant 2 : index
    %5 = vector.load %arg0[%c0_5, %c2_6] : memref<2x650xf32, #tpu.memory_space<vmem>>, vector<2x576xf32>
    %c4 = arith.constant 4 : index
    %c0_7 = arith.constant 0 : index
    %6 = vector.load %arg4[%c4, %c0_7] : memref<19x576xf32, #tpu.memory_space<vmem>>, vector<2x576xf32>
    tpu.vector_store %arg4[%c4, %c0_7], %5 {strides = array<i32>} : memref<19x576xf32, #tpu.memory_space<vmem>>, vector<2x576xf32>,
    %c0_8 = arith.constant 0 : index
    %c36 = arith.constant 36 : index
    %7 = vector.load %arg0[%c0_8, %c36] : memref<2x650xf32, #tpu.memory_space<vmem>>, vector<2x576xf32>
    %c6 = arith.constant 6 : index
    %c0_9 = arith.constant 0 : index
    %8 = vector.load %arg4[%c6, %c0_9] : memref<19x576xf32, #tpu.memory_space<vmem>>, vector<2x576xf32>
    tpu.vector_store %arg4[%c6, %c0_9], %7 {strides = array<i32>} : memref<19x576xf32, #tpu.memory_space<vmem>>, vector<2x576xf32>,
    %c0_10 = arith.constant 0 : index
    %c37 = arith.constant 37 : index
    %9 = vector.load %arg0[%c0_10, %c37] : memref<2x650xf32, #tpu.memory_space<vmem>>, vector<2x576xf32>
    %c8 = arith.constant 8 : index
    %c0_11 = arith.constant 0 : index
    %10 = vector.load %arg4[%c8, %c0_11] : memref<19x576xf32, #tpu.memory_space<vmem>>, vector<2x576xf32>
    tpu.vector_store %arg4[%c8, %c0_11], %9 {strides = array<i32>} : memref<19x576xf32, #tpu.memory_space<vmem>>, vector<2x576xf32>,
    %c0_12 = arith.constant 0 : index
    %c38 = arith.constant 38 : index
    %11 = vector.load %arg0[%c0_12, %c38] : memref<2x650xf32, #tpu.memory_space<vmem>>, vector<2x576xf32>
    %c10 = arith.constant 10 : index
    %c0_13 = arith.constant 0 : index
    %12 = vector.load %arg4[%c10, %c0_13] : memref<19x576xf32, #tpu.memory_space<vmem>>, vector<2x576xf32>
    tpu.vector_store %arg4[%c10, %c0_13], %11 {strides = array<i32>} : memref<19x576xf32, #tpu.memory_space<vmem>>, vector<2x576xf32>,
    %c0_14 = arith.constant 0 : index
    %c72 = arith.constant 72 : index
    %13 = vector.load %arg0[%c0_14, %c72] : memref<2x650xf32, #tpu.memory_space<vmem>>, vector<2x576xf32>
    %c12 = arith.constant 12 : index
    %c0_15 = arith.constant 0 : index
    %14 = vector.load %arg4[%c12, %c0_15] : memref<19x576xf32, #tpu.memory_space<vmem>>, vector<2x576xf32>
    tpu.vector_store %arg4[%c12, %c0_15], %13 {strides = array<i32>} : memref<19x576xf32, #tpu.memory_space<vmem>>, vector<2x576xf32>,
    %c0_16 = arith.constant 0 : index
    %c73 = arith.constant 73 : index
    %15 = vector.load %arg0[%c0_16, %c73] : memref<2x650xf32, #tpu.memory_space<vmem>>, vector<2x576xf32>
    %c14 = arith.constant 14 : index
    %c0_17 = arith.constant 0 : index
    %16 = vector.load %arg4[%c14, %c0_17] : memref<19x576xf32, #tpu.memory_space<vmem>>, vector<2x576xf32>
    tpu.vector_store %arg4[%c14, %c0_17], %15 {strides = array<i32>} : memref<19x576xf32, #tpu.memory_space<vmem>>, vector<2x576xf32>,
    %c0_18 = arith.constant 0 : index
    %c74 = arith.constant 74 : index
    %17 = vector.load %arg0[%c0_18, %c74] : memref<2x650xf32, #tpu.memory_space<vmem>>, vector<2x576xf32>
    %c16 = arith.constant 16 : index
    %c0_19 = arith.constant 0 : index
    %18 = vector.load %arg4[%c16, %c0_19] : memref<19x576xf32, #tpu.memory_space<vmem>>, vector<2x576xf32>
    tpu.vector_store %arg4[%c16, %c0_19], %17 {strides = array<i32>} : memref<19x576xf32, #tpu.memory_space<vmem>>, vector<2x576xf32>,
    %c18 = arith.constant 18 : index
    %c0_20 = arith.constant 0 : index
    %19 = vector.load %arg4[%c18, %c0_20] : memref<19x576xf32, #tpu.memory_space<vmem>>, vector<1x576xf32>
    tpu.vector_store %arg4[%c18, %c0_20], %0 {strides = array<i32>} : memref<19x576xf32, #tpu.memory_space<vmem>>, vector<1x576xf32>,
    %c0_21 = arith.constant 0 : index
    %c0_22 = arith.constant 0 : index
    %20 = vector.load %arg1[%c0_21, %c0_22] : memref<16x19xf32, #tpu.memory_space<vmem>>, vector<16x19xf32>
    %c0_23 = arith.constant 0 : index
    %c0_24 = arith.constant 0 : index
    %21 = vector.load %arg4[%c0_23, %c0_24] : memref<19x576xf32, #tpu.memory_space<vmem>>, vector<19x576xf32>
    %cst_25 = arith.constant dense<0.000000e+00> : vector<16x576xf32>
    %22 = tpu.matmul %20, %21, %cst_25 {dimension_numbers = #tpu.dot_dimension_numbers<[1], [0], [0], [1], [0, 0, 1, 1], [], []>} : vector<16x19xf32>, vector<19x576xf32>, vector<16x576xf32> -> vector<16x576xf32>
    %cst_26 = arith.constant 0.000000e+00 : f32
    %23 = vector.broadcast %cst_26 : f32 to vector<16x576xf32>
    %24 = arith.maximumf %22, %23 : vector<16x576xf32>
    %25 = tpu.iota {dimensions = array<i32: 1>} : vector<1x576xi32>
    %c18_i32 = arith.constant 18 : i32
    %c0_i32 = arith.constant 0 : i32
    %26 = arith.cmpi eq, %c18_i32, %c0_i32 : i32
    %c1_i32 = arith.constant 1 : i32
    %27 = arith.select %26, %c1_i32, %c18_i32 : i32
    %28 = vector.broadcast %27 : i32 to vector<1x576xi32>
    %29 = arith.remsi %25, %28 : vector<1x576xi32>
    %c0_i32_27 = arith.constant 0 : i32
    %30 = vector.broadcast %c0_i32_27 : i32 to vector<1x576xi32>
    %31 = arith.cmpi ne, %29, %30 : vector<1x576xi32>
    %c0_i32_28 = arith.constant 0 : i32
    %32 = vector.broadcast %c0_i32_28 : i32 to vector<1x576xi32>
    %33 = arith.cmpi slt, %29, %32 : vector<1x576xi32>
    %c0_i32_29 = arith.constant 0 : i32
    %34 = arith.cmpi slt, %27, %c0_i32_29 : i32
    %35 = vector.broadcast %34 : i1 to vector<1x576xi1>
    %36 = vector.broadcast %35 : vector<1x576xi1> to vector<1x576xi1>
    %37 = arith.xori %33, %36 : vector<1x576xi1>
    %38 = arith.andi %37, %31 : vector<1x576xi1>
    %39 = vector.broadcast %27 : i32 to vector<1x576xi32>
    %40 = arith.addi %29, %39 : vector<1x576xi32>
    %41 = arith.select %38, %40, %29 : vector<1x576xi1>, vector<1x576xi32>
    %c16_i32 = arith.constant 16 : i32
    %42 = vector.broadcast %c16_i32 : i32 to vector<1x576xi32>
    %43 = arith.cmpi slt, %41, %42 : vector<1x576xi32>
    %44 = arith.extui %43 : vector<1x576xi1> to vector<1x576xi32>
    %45 = arith.sitofp %44 : vector<1x576xi32> to vector<1x576xf32>
    %cst_30 = arith.constant 0.000000e+00 : f32
    %46 = vector.broadcast %cst_30 : f32 to vector<16x650xf32>
    %c0_31 = arith.constant 0 : index
    %c0_32 = arith.constant 0 : index
    %47 = vector.load %arg5[%c0_31, %c0_32] : memref<16x650xf32, #tpu.memory_space<vmem>>, vector<16x650xf32>
    tpu.vector_store %arg5[%c0_31, %c0_32], %46 {strides = array<i32>} : memref<16x650xf32, #tpu.memory_space<vmem>>, vector<16x650xf32>,
    %48 = vector.broadcast %45 : vector<1x576xf32> to vector<16x576xf32>
    %49 = arith.mulf %24, %48 : vector<16x576xf32>
    %c0_33 = arith.constant 0 : index
    %c37_34 = arith.constant 37 : index
    %50 = vector.load %arg5[%c0_33, %c37_34] : memref<16x650xf32, #tpu.memory_space<vmem>>, vector<16x576xf32>
    tpu.vector_store %arg5[%c0_33, %c37_34], %49 {strides = array<i32>} : memref<16x650xf32, #tpu.memory_space<vmem>>, vector<16x576xf32>,
    %c0_35 = arith.constant 0 : index
    %c0_36 = arith.constant 0 : index
    %51 = vector.load %arg5[%c0_35, %c0_36] : memref<16x650xf32, #tpu.memory_space<vmem>>, vector<16x576xf32>
    %c0_37 = arith.constant 0 : index
    %c0_38 = arith.constant 0 : index
    %52 = vector.load %arg6[%c0_37, %c0_38] : memref<145x576xf32, #tpu.memory_space<vmem>>, vector<16x576xf32>
    tpu.vector_store %arg6[%c0_37, %c0_38], %51 {strides = array<i32>} : memref<145x576xf32, #tpu.memory_space<vmem>>, vector<16x576xf32>,
    %c0_39 = arith.constant 0 : index
    %c1_40 = arith.constant 1 : index
    %53 = vector.load %arg5[%c0_39, %c1_40] : memref<16x650xf32, #tpu.memory_space<vmem>>, vector<16x576xf32>
    %c16_41 = arith.constant 16 : index
    %c0_42 = arith.constant 0 : index
    %54 = vector.load %arg6[%c16_41, %c0_42] : memref<145x576xf32, #tpu.memory_space<vmem>>, vector<16x576xf32>
    tpu.vector_store %arg6[%c16_41, %c0_42], %53 {strides = array<i32>} : memref<145x576xf32, #tpu.memory_space<vmem>>, vector<16x576xf32>,
    %c0_43 = arith.constant 0 : index
    %c2_44 = arith.constant 2 : index
    %55 = vector.load %arg5[%c0_43, %c2_44] : memref<16x650xf32, #tpu.memory_space<vmem>>, vector<16x576xf32>
    %c32 = arith.constant 32 : index
    %c0_45 = arith.constant 0 : index
    %56 = vector.load %arg6[%c32, %c0_45] : memref<145x576xf32, #tpu.memory_space<vmem>>, vector<16x576xf32>
    tpu.vector_store %arg6[%c32, %c0_45], %55 {strides = array<i32>} : memref<145x576xf32, #tpu.memory_space<vmem>>, vector<16x576xf32>,
    %c0_46 = arith.constant 0 : index
    %c36_47 = arith.constant 36 : index
    %57 = vector.load %arg5[%c0_46, %c36_47] : memref<16x650xf32, #tpu.memory_space<vmem>>, vector<16x576xf32>
    %c48 = arith.constant 48 : index
    %c0_48 = arith.constant 0 : index
    %58 = vector.load %arg6[%c48, %c0_48] : memref<145x576xf32, #tpu.memory_space<vmem>>, vector<16x576xf32>
    tpu.vector_store %arg6[%c48, %c0_48], %57 {strides = array<i32>} : memref<145x576xf32, #tpu.memory_space<vmem>>, vector<16x576xf32>,
    %c0_49 = arith.constant 0 : index
    %c37_50 = arith.constant 37 : index
    %59 = vector.load %arg5[%c0_49, %c37_50] : memref<16x650xf32, #tpu.memory_space<vmem>>, vector<16x576xf32>
    %c64 = arith.constant 64 : index
    %c0_51 = arith.constant 0 : index
    %60 = vector.load %arg6[%c64, %c0_51] : memref<145x576xf32, #tpu.memory_space<vmem>>, vector<16x576xf32>
    tpu.vector_store %arg6[%c64, %c0_51], %59 {strides = array<i32>} : memref<145x576xf32, #tpu.memory_space<vmem>>, vector<16x576xf32>,
    %c0_52 = arith.constant 0 : index
    %c38_53 = arith.constant 38 : index
    %61 = vector.load %arg5[%c0_52, %c38_53] : memref<16x650xf32, #tpu.memory_space<vmem>>, vector<16x576xf32>
    %c80 = arith.constant 80 : index
    %c0_54 = arith.constant 0 : index
    %62 = vector.load %arg6[%c80, %c0_54] : memref<145x576xf32, #tpu.memory_space<vmem>>, vector<16x576xf32>
    tpu.vector_store %arg6[%c80, %c0_54], %61 {strides = array<i32>} : memref<145x576xf32, #tpu.memory_space<vmem>>, vector<16x576xf32>,
    %c0_55 = arith.constant 0 : index
    %c72_56 = arith.constant 72 : index
    %63 = vector.load %arg5[%c0_55, %c72_56] : memref<16x650xf32, #tpu.memory_space<vmem>>, vector<16x576xf32>
    %c96 = arith.constant 96 : index
    %c0_57 = arith.constant 0 : index
    %64 = vector.load %arg6[%c96, %c0_57] : memref<145x576xf32, #tpu.memory_space<vmem>>, vector<16x576xf32>
    tpu.vector_store %arg6[%c96, %c0_57], %63 {strides = array<i32>} : memref<145x576xf32, #tpu.memory_space<vmem>>, vector<16x576xf32>,
    %c0_58 = arith.constant 0 : index
    %c73_59 = arith.constant 73 : index
    %65 = vector.load %arg5[%c0_58, %c73_59] : memref<16x650xf32, #tpu.memory_space<vmem>>, vector<16x576xf32>
    %c112 = arith.constant 112 : index
    %c0_60 = arith.constant 0 : index
    %66 = vector.load %arg6[%c112, %c0_60] : memref<145x576xf32, #tpu.memory_space<vmem>>, vector<16x576xf32>
    tpu.vector_store %arg6[%c112, %c0_60], %65 {strides = array<i32>} : memref<145x576xf32, #tpu.memory_space<vmem>>, vector<16x576xf32>,
    %c0_61 = arith.constant 0 : index
    %c74_62 = arith.constant 74 : index
    %67 = vector.load %arg5[%c0_61, %c74_62] : memref<16x650xf32, #tpu.memory_space<vmem>>, vector<16x576xf32>
    %c128 = arith.constant 128 : index
    %c0_63 = arith.constant 0 : index
    %68 = vector.load %arg6[%c128, %c0_63] : memref<145x576xf32, #tpu.memory_space<vmem>>, vector<16x576xf32>
    tpu.vector_store %arg6[%c128, %c0_63], %67 {strides = array<i32>} : memref<145x576xf32, #tpu.memory_space<vmem>>, vector<16x576xf32>,
    %c144 = arith.constant 144 : index
    %c0_64 = arith.constant 0 : index
    %69 = vector.load %arg6[%c144, %c0_64] : memref<145x576xf32, #tpu.memory_space<vmem>>, vector<1x576xf32>
    tpu.vector_store %arg6[%c144, %c0_64], %0 {strides = array<i32>} : memref<145x576xf32, #tpu.memory_space<vmem>>, vector<1x576xf32>,
    %c0_65 = arith.constant 0 : index
    %c0_66 = arith.constant 0 : index
    %70 = vector.load %arg2[%c0_65, %c0_66] : memref<2x145xf32, #tpu.memory_space<vmem>>, vector<2x145xf32>
    %c0_67 = arith.constant 0 : index
    %c0_68 = arith.constant 0 : index
    %71 = vector.load %arg6[%c0_67, %c0_68] : memref<145x576xf32, #tpu.memory_space<vmem>>, vector<145x576xf32>
    %cst_69 = arith.constant dense<0.000000e+00> : vector<2x576xf32>
    %72 = tpu.matmul %70, %71, %cst_69 {dimension_numbers = #tpu.dot_dimension_numbers<[1], [0], [0], [1], [0, 0, 1, 1], [], []>} : vector<2x145xf32>, vector<145x576xf32>, vector<2x576xf32> -> vector<2x576xf32>
    %c0_70 = arith.constant 0 : index
    %c0_71 = arith.constant 0 : index
    %73 = vector.load %arg3[%c0_70, %c0_71] : memref<2x576xf32, #tpu.memory_space<vmem>>, vector<2x576xf32>
    tpu.vector_store %arg3[%c0_70, %c0_71], %72 {strides = array<i32>} : memref<2x576xf32, #tpu.memory_space<vmem>>, vector<2x576xf32>,
    return
  }
}

</mosaic_0001>

<bundles_post_ra>
// kernel: tpu_custom_call.1
= control target key start
LH: loop header
LB: loop body
LE: loop exit
PB: predicated region body
PF: predicated region fallthrough
CT: control target
= control target key end

     0   :  { %8 = vsyncpa [#allocation6], 0  ;;  %s3007_s0 = inlined_call_operand.hbm [shape: f32[2,650], index: 0, kind: input, shape index: {}]   ;;  %s3008_s1 = inlined_call_operand.hbm [shape: f32[16,19], index: 1, kind: input, shape index: {}]   ;;  %s3009_s2 = inlined_call_operand.vmem [shape: f32[2,145], index: 2, kind: input, shape index: {}]   ;;  %s3010_s3 = inlined_call_operand.hbm [shape: f32[2,576], index: 3, kind: output, shape index: {}]  }
   0x1   :  { %9 = vsyncpa [#allocation9], 0 }
   0x2   :  { %10 = vsyncpa [#allocation7], 0  ;;  %s2243_s12 = smov [#allocation5]   ;;  %s2244_s14 = smov [#allocation8]  }
   0x3   :  { %s17_s13 = sshll.u32 %s2243_s12, 4  ;;  %s26_s15 = sshll.u32 %s2244_s14, 4  ;;  %s18_s13 = int_to_ptr.vmem [resolvable:$true] %s17_s13  ;;  %s2281_s15 = int_to_ptr.vmem [resolvable:$true] %s26_s15 }
   0x4   :  { %s2171_s18 = scalar_lea.hbm %s3007_s0, 192 }
   0x5   :  { %p2172_p0 = scmp.ne.s32.totalorder %s3007_s0, %s2171_s18  ;;  %p2175_p1 = scmp.lt.u32.totalorder %s2171_s18, %s3007_s0 }
   0x7   :  { %p2177_p2 = pnand %p2175_p1, %p2172_p0 }
   0x9   :  { %2180 = shalt.err (!%p2177_p2)
}
   0xa   :  { %s2181_s23 = scalar_lea.vmem %s18_s13, 192  ;;  %p2186_p4 = scmp.lt.s32.totalorder %s18_s13, %s18_s13 }
   0xb   :  { %p2182_p3 = scmp.ne.s32.totalorder %s18_s13, %s2181_s23  ;;  %p2187_p5 = scmp.lt.s32.totalorder %s2181_s23, %s2181_s23 }
   0xd   :  { %p2188_p6 = por %p2187_p5, %p2186_p4 }
   0xf   :  { %p2189_p7 = pnand %p2188_p6, %p2182_p3 }
  0x11   :  { %2192 = shalt.err (!%p2189_p7)
}
  0x12   :  { %20 = dma.hbm_to_vmem [thread:$0]  %s3007_s0, 192, %s18_s13, [#allocation6]  }
  0x13   :  { %s2193_s28 = scalar_lea.hbm %s3008_s1, 256 }
  0x14   :  { %p2194_p8 = scmp.ne.s32.totalorder %s3008_s1, %s2193_s28  ;;  %p2197_p9 = scmp.lt.u32.totalorder %s2193_s28, %s3008_s1 }
  0x16   :  { %p2199_p10 = pnand %p2197_p9, %p2194_p8 }
  0x18   :  { %2202 = shalt.err (!%p2199_p10)
}
  0x19   :  { %s2203_s6 = scalar_lea.vmem %s2281_s15, 256  ;;  %p2208_p12 = scmp.lt.s32.totalorder %s2281_s15, %s2281_s15 }
  0x1a   :  { %p2204_p11 = scmp.ne.s32.totalorder %s2281_s15, %s2203_s6  ;;  %p2209_p13 = scmp.lt.s32.totalorder %s2203_s6, %s2203_s6 }
  0x1c   :  { %p2210_p0 = por %p2209_p13, %p2208_p12 }
  0x1e   :  { %p2211_p1 = pnand %p2210_p0, %p2204_p11 }
  0x20   :  { %2214 = shalt.err (!%p2211_p1)
}
  0x21   :  { %s2245_s0 = smov 128   ;;  %s2246_s7 = smov 8  }
  0x22   :  { %32 = dma.hbm_to_vmem [thread:$0]  %s3008_s1, 256, %s2281_s15, [#allocation9], %s2245_s0, %s2245_s0, %s2246_s7  }
  0x23   :  { %2237 = dma.done.wait [#allocation6], 192  }
  0x24   :  { %2238 = vsyncadd [#allocation6], 4294967104 }
  0x25   :  { %2239 = dma.done.wait [#allocation9], 256  }
  0x26   :  { %2240 = vsyncadd [#allocation9], 4294967040  ;;  %v49_v0 = vlaneseq  ;;  %v2247_v1 = vmov 1983009808   ;;  %v135_v6 = vld [vmem:[#allocation5] sm:$0xff]  ;;  %s2248_s1 = smov 126  }
  0x27   :  { %v47_v2 = vunpack.c.l.s4 %v2247_v1  ;;  %v139_v8 = vcombine.high %v135_v6, %v135_v6  ;;  %v84_v9 = vcombine.low %v135_v6, %v135_v6  ;;  %1981 = vst.sshfl [vmem:[#allocation2] sm:$0x3 pattern:$0x76325410] %v135_v6  ;;  %s2249_s10 = smov 127   ;;  %s2250_s11 = smov 92  }
  0x28   :  { %v50_v3 = vshrl.u32 %v49_v0, 7  ;;  %s2251_s12 = smov 91   ;;  %s2252_s13 = smov 90   ;;  %vm527_vm0 = vcmp.lt.s32.totalorder %v49_v0, 576  ;;  %v2255_v17 = vmov 1.0   ;;  %v2257_v19 = vmov 0.0  }
  0x29   :  { %v48_v4 = vunpack.c.0.s8 %v47_v2  ;;  %1982 = vst.sshfl [vmem:[#allocation2 + $0x10] sm:$0x3 pattern:$0x76325410] %v139_v8  ;;  %s2253_s14 = smov 56   ;;  %s2254_s15 = smov 55   ;;  %636 = vmatprep.mubr.f32.mxu0 %v2257_v19 }
  0x2a   :  { %530 = vst.msk [vmem:[#allocation2 + $0x52] ss:$8 sm:$0xf] %vm527_vm0, %v2255_v17  ;;  %531 = vst.msk [vmem:[#allocation2 + $0x52] ss:$8 sm:$0x10] %vm527_vm0, %v2255_v17 }
  0x2b   :  { %v2313_v5 = vsub.s32 %v48_v4, %v50_v3  ;;  %1592 = vst.msk [vmem:[#allocation4 + $0x2d0] ss:$8 sm:$0xf] %vm527_vm0, %v2255_v17  ;;  %1593 = vst.msk [vmem:[#allocation4 + $0x2d0] ss:$8 sm:$0x10] %vm527_vm0, %v2255_v17 }
  0x2c   :  { %s2256_s16 = smov 54   ;;  %v2167_v18 = vld [vmem:[#allocation5 + $0x8] ss:$0 sps:$4 sm:$0x33]   ;;  %912 = vst [vmem:[#allocation3] sm:$0xff] %v2257_v19  ;;  %916 = vst [vmem:[#allocation3 + $0x20] sm:$0xff] %v2257_v19 }
  0x2d   :  { %v2316_v7 = vrot.slane %v135_v6, %v2313_v5  ;;  %v91_v11 = vrot.slane %v84_v9, %v2313_v5  ;;  %v2326_v12 = vrot.slane %v139_v8, %v2313_v5  ;;  %919 = vst [vmem:[#allocation3 + $0x30] sm:$0xff] %v2257_v19  ;;  %923 = vst [vmem:[#allocation3 + $0x50] sm:$0xff] %v2257_v19  ;;  %v1983_v20 = vld.sshfl [vmem:[#allocation5 + $0x8] sm:$0x3 pattern:$0x76325410] }
  0x2e   :  { %v108_v21 = vrot.slane %v2167_v18, %v2313_v5  ;;  %v2168_v22 = vld [vmem:[#allocation5 + $0x8] ss:$0 sps:$4 sm:$0x33]   ;;  %vm3011_vm1 = vcmask 517120   ;;  %v163_v24 = vcombine.low %v1983_v20, %v1983_v20  ;;  %vm230_vm2 = vcmask 752640   ;;  %s2258_s17 = smov 37  }
  0x2f   :  { %166 = vrot.lane.b32.xlu1 %v2316_v7, %s2248_s1  ;;  %v154_v10 = vcombine.low %v2316_v7, %v2316_v7  ;;  %113 = vrot.lane.b32.xlu0 %v2316_v7, %s2249_s10  ;;  %v2332_v13 = vcombine.high %v2316_v7, %v2316_v7  ;;  %v155_v14 = vcombine.low %v2326_v12, %v2326_v12  ;;  %v2169_v27 = vld [vmem:[#allocation5 + $0x8] ss:$0 sps:$4 sm:$0x33]   ;;  %vm284_vm3 = vcmask 744448  }
  0x30   :  { %v99_v15 = vcombine.high %v91_v11, %v91_v11  ;;  %v209_v16 = vcombine.low %v91_v11, %v91_v11  ;;  %79 = vst.msk [vmem:[#allocation2 + $0x20] sm:$0x3] %vm3011_vm1, %v1983_v20  ;;  %v61_v23 = vcombine.high %v2326_v12, %v2326_v12  ;;  %v218_v25 = vrot.slane %v2168_v22, %v2313_v5  ;;  %v2170_v29 = vld [vmem:[#allocation5 + $0x8] ss:$0 sps:$4 sm:$0xff]  }
  0x31   :  { %75 = vst [vmem:[#allocation2 + $0x8] sm:$0x3] %v2332_v13  ;;  %v327_v28 = vrot.slane %v2169_v27, %v2313_v5  ;;  %v1985_v30 = vld.sshfl [vmem:[#allocation5 + $0x8] sm:$0x33 pattern:$0x76325410]  ;;  %v438_v32 = vrot.slane %v2170_v29, %v2313_v5 }
  0x32   :  { %77 = vst [vmem:[#allocation2 + $0x18] sm:$0x3] %v61_v23  ;;  %v219_v26 = vcombine.low %v218_v25, %v218_v25  ;;  %v381_v31 = vcombine.low %v1985_v30, %v1985_v30  ;;  %v496_v34 = vcombine.high %v1985_v30, %v1985_v30  ;;  %vm174_vm4 = vcmask 1031168   ;;  %v2452_v29 = vld [vmem:[#allocation8] sm:$0xff] }
  0x33   :  { %224 = vrot.lane.b32.xlu1 %v154_v10, %s2250_s11  ;;  %222 = vrot.lane.b32.xlu0 %v91_v11, %s2250_s11  ;;  %v439_v33 = vcombine.low %v438_v32, %v438_v32  ;;  %vm119_vm5 = vcmask 1039360   ;;  %vm338_vm6 = vcmask 736256   ;;  %vm3014_vm7 = vcmask 457728  }
  0x34   :  { %vm3013_vm8 = vcmask 449536   ;;  %vm3012_vm9 = vcmask 441344   ;;  %vm133_vm10 = vcmask 519170   ;;  %vm188_vm11 = vcmask 521220  }
  0x35   :  { %vm556_vm12 = vcmask 1042432   ;;  %vm244_vm13 = vcmask 523270   ;;  %vm549_vm14 = vcmask 154624   ;;  %vm917_vm15 = vcmask 80896  }
  0x36   :  { %918 = vst.msk [vmem:[#allocation3 + $0x28] sm:$0xff] %vm917_vm15, %v2257_v19  ;;  %924 = vst.msk [vmem:[#allocation3 + $0x58] sm:$0xff] %vm917_vm15, %v2257_v19 }
  0x37   :  { %278 = vrot.lane.b32.xlu1 %v2326_v12, %s2251_s12  ;;  %276 = vrot.lane.b32.xlu0 %v2332_v13, %s2251_s12 }
  0x3b   :  { %168 = vrot.lane.b32.xlu1 %v155_v14, %s2248_s1  ;;  %111 = vrot.lane.b32.xlu0 %v99_v15, %s2249_s10 }
  0x3f   :  { %332 = vrot.lane.b32.xlu1 %v2316_v7, %s2252_s13  ;;  %330 = vrot.lane.b32.xlu0 %v99_v15, %s2252_s13 }
  0x43   :  { %386 = vrot.lane.b32.xlu1 %v155_v14, %s2253_s14  ;;  %384 = vrot.lane.b32.xlu0 %v2316_v7, %s2253_s14 }
  0x47   :  { %444 = vrot.lane.b32.xlu1 %v154_v10, %s2254_s15  ;;  %442 = vrot.lane.b32.xlu0 %v91_v11, %s2254_s15 }
  0x4b   :  { %164 = vrot.lane.b32.xlu1 %v154_v10, %s2248_s1  ;;  %109 = vrot.lane.b32.xlu0 %v91_v11, %s2249_s10 }
  0x4f   :  { %274 = vrot.lane.b32.xlu1 %v2316_v7, %s2251_s12  ;;  %220 = vrot.lane.b32.xlu0 %v209_v16, %s2250_s11 }
  0x53   :  { %382 = vrot.lane.b32.xlu1 %v154_v10, %s2253_s14  ;;  %328 = vrot.lane.b32.xlu0 %v91_v11, %s2252_s13 }
  0x57   :  { %499 = vrot.lane.b32.xlu1 %v2332_v13, %s2256_s16  ;;  %440 = vrot.lane.b32.xlu0 %v209_v16, %s2254_s15 }
  0x5b   :  { %497 = vrot.lane.b32.xlu1 %v2316_v7, %s2256_s16  ;;  %501 = vrot.lane.b32.xlu0 %v2326_v12, %s2256_s16 }
  0x5f   :  { %117 = vrot.lane.b32.xlu1 %v108_v21, %s2249_s10  ;;  %115 = vrot.lane.b32.xlu0 %v2332_v13, %s2249_s10 }
  0x63   :  { %172 = vrot.lane.b32.xlu1 %v163_v24, %s2248_s1  ;;  %170 = vrot.lane.b32.xlu0 %v2326_v12, %s2248_s1 }
  0x67   :  { %228 = vrot.lane.b32.xlu1 %v219_v26, %s2250_s11  ;;  %226 = vrot.lane.b32.xlu0 %v2316_v7, %s2250_s11 }
  0x6b   :  { %282 = vrot.lane.b32.xlu1 %v1983_v20, %s2251_s12  ;;  %280 = vrot.lane.b32.xlu0 %v61_v23, %s2251_s12 }
  0x6f   :  { %336 = vrot.lane.b32.xlu1 %v327_v28, %s2252_s13  ;;  %334 = vrot.lane.b32.xlu0 %v2332_v13, %s2252_s13 }
  0x73   :  { %390 = vrot.lane.b32.xlu1 %v381_v31, %s2253_s14  ;;  %388 = vrot.lane.b32.xlu0 %v2326_v12, %s2253_s14 }
  0x77   :  { %448 = vrot.lane.b32.xlu1 %v439_v33, %s2254_s15  ;;  %446 = vrot.lane.b32.xlu0 %v2316_v7, %s2254_s15 }
  0x7b   :  { %505 = vrot.lane.b32.xlu1 %v1985_v30, %s2256_s16  ;;  %503 = vrot.lane.b32.xlu0 %v61_v23, %s2256_s16 }
  0x7f   :  { %450 = vrot.lane.b32.xlu1 %v438_v32, %s2254_s15  ;;  %392 = vrot.lane.b32.xlu0 %v1985_v30, %s2253_s14 }
  0x83   :  { %507 = vrot.lane.b32.xlu0 %v496_v34, %s2256_s16 }
  0xa1   :  { %v167_v35 = vpop.permute.xlu1 %166  ;;  %v2403_v36 = vpop.permute.xlu0 %113 }
  0xa5   :  { %v2405_v37 = vpop.permute.xlu1 %224  ;;  %v223_v38 = vpop.permute.xlu0 %222 }
  0xa6   :  { %v232_v39 = vsel %vm230_vm2, %v223_v38, %v2405_v37 }
  0xa7   :  { %241 = vst [vmem:[#allocation2 + $0x8] sm:$0xc0] %v232_v39 }
  0xa9   :  { %v2409_v40 = vpop.permute.xlu1 %278  ;;  %v277_v41 = vpop.permute.xlu0 %276 }
  0xaa   :  { %v286_v42 = vsel %vm284_vm3, %v277_v41, %v2409_v40 }
  0xab   :  { %295 = vst [vmem:[#allocation2 + $0x30] sm:$0x3] %v286_v42 }
  0xad   :  { %v2413_v43 = vpop.permute.xlu1 %168  ;;  %v112_v44 = vpop.permute.xlu0 %111 }
  0xae   :  { %v176_v45 = vsel %vm174_vm4, %v167_v35, %v2413_v43  ;;  %v121_v46 = vsel %vm119_vm5, %v112_v44, %v2403_v36 }
  0xaf   :  { %185 = vst [vmem:[#allocation2 + $0x8] sm:$0x30] %v176_v45  ;;  %130 = vst [vmem:[#allocation2 + $0x8] sm:$0xc] %v121_v46 }
  0xb1   :  { %v2419_v47 = vpop.permute.xlu1 %332  ;;  %v331_v48 = vpop.permute.xlu0 %330 }
  0xb2   :  { %v340_v49 = vsel %vm338_vm6, %v331_v48, %v2419_v47 }
  0xb3   :  { %349 = vst [vmem:[#allocation2 + $0x30] sm:$0xc] %v340_v49 }
  0xb5   :  { %v2423_v50 = vpop.permute.xlu1 %386  ;;  %v385_v51 = vpop.permute.xlu0 %384 }
  0xb6   :  { %v396_v52 = vsel %vm3014_vm7, %v385_v51, %v2423_v50  ;;  %v535_v1 = vld [vmem:[#allocation2 + $0x8] sm:$0xff] }
  0xb7   :  { %406 = vst [vmem:[#allocation2 + $0x30] sm:$0x30] %v396_v52 }
  0xb9   :  { %v2427_v53 = vpop.permute.xlu1 %444  ;;  %v443_v54 = vpop.permute.xlu0 %442 }
  0xba   :  { %v454_v55 = vsel %vm3013_vm8, %v443_v54, %v2427_v53 }
  0xbb   :  { %464 = vst [vmem:[#allocation2 + $0x30] sm:$0xc0] %v454_v55 }
  0xbd   :  { %v165_v56 = vpop.permute.xlu1 %164  ;;  %v110_v57 = vpop.permute.xlu0 %109 }
  0xbe   :  { %v175_v58 = vsel %vm174_vm4, %v165_v56, %v167_v35  ;;  %v120_v59 = vsel %vm119_vm5, %v110_v57, %v112_v44  ;;  %v2462_v35 = vld [vmem:[#allocation8 + $0x8] sm:$0xff] }
  0xbf   :  { %184 = vst [vmem:[#allocation2] sm:$0x30] %v175_v58  ;;  %129 = vst [vmem:[#allocation2] sm:$0xc] %v120_v59 }
  0xc1   :  { %v275_v60 = vpop.permute.xlu1 %274  ;;  %v221_v61 = vpop.permute.xlu0 %220 }
  0xc2   :  { %v285_v62 = vsel %vm284_vm3, %v275_v60, %v277_v41  ;;  %v231_v63 = vsel %vm230_vm2, %v221_v61, %v223_v38  ;;  %v540_v2 = vld [vmem:[#allocation2 + $0x30] sm:$0xff] }
  0xc3   :  { %294 = vst [vmem:[#allocation2 + $0x28] sm:$0x3] %v285_v62  ;;  %240 = vst [vmem:[#allocation2] sm:$0xc0] %v231_v63  ;;  %v2026_v3 = vpack.c.bf16 %v540_v2, %v535_v1 }
  0xc5   :  { %v383_v4 = vpop.permute.xlu1 %382  ;;  %v329_v6 = vpop.permute.xlu0 %328  ;;  %2027 = vmatprep.subr.bf16.mxu0 %v2026_v3 }
  0xc6   :  { %v395_v7 = vsel %vm3014_vm7, %v383_v4, %v385_v51  ;;  %v339_v8 = vsel %vm338_vm6, %v329_v6, %v331_v48 }
  0xc7   :  { %405 = vst [vmem:[#allocation2 + $0x28] sm:$0x30] %v395_v7  ;;  %348 = vst [vmem:[#allocation2 + $0x28] sm:$0xc] %v339_v8 }
  0xc9   :  { %v500_v9 = vpop.permute.xlu1 %499  ;;  %v441_v10 = vpop.permute.xlu0 %440 }
  0xca   :  { %v453_v11 = vsel %vm3013_vm8, %v441_v10, %v443_v54  ;;  %v534_v21 = vld [vmem:[#allocation2] sm:$0xff] }
  0xcb   :  { %463 = vst [vmem:[#allocation2 + $0x28] sm:$0xc0] %v453_v11 }
  0xcd   :  { %v498_v12 = vpop.permute.xlu1 %497  ;;  %v2438_v13 = vpop.permute.xlu0 %501 }
  0xce   :  { %v510_v14 = vsel %vm3012_vm9, %v498_v12, %v500_v9  ;;  %v511_v15 = vsel %vm3012_vm9, %v500_v9, %v2438_v13  ;;  %v2505_v12 = vld [vmem:[#allocation3 + $0x28] sm:$0xff] }
  0xcf   :  { %520 = vst [vmem:[#allocation2 + $0x50] sm:$0x3] %v510_v14  ;;  %521 = vst [vmem:[#allocation2 + $0x58] sm:$0x3] %v511_v15  ;;  %1391 = vrot.lane.b32.xlu1 %v2505_v12, %s2253_s14  ;;  %v812_v14 = vand.u32 127, %v49_v0 }
  0xd1   :  { %v118_v16 = vpop.permute.xlu1 %117  ;;  %v116_v17 = vpop.permute.xlu0 %115  ;;  %v813_v15 = vadd.s32 128, %v812_v14 }
  0xd2   :  { %134 = vst.msk [vmem:[#allocation2 + $0x20] sm:$0xc] %vm133_vm10, %v118_v16  ;;  %v122_v18 = vsel %vm119_vm5, %v2403_v36, %v116_v17  ;;  %v123_v20 = vsel %vm119_vm5, %v116_v17, %v118_v16  ;;  %v539_v22 = vld [vmem:[#allocation2 + $0x28] sm:$0xff]  ;;  %v2514_v16 = vmul.u32.u64.low 3817748708, %v812_v14  ;;  %v2515_v17 = vmul.u32.u64.high 3817748708, %v812_v14, %v2514_v16 }
  0xd3   :  { %131 = vst [vmem:[#allocation2 + $0x10] sm:$0xc] %v122_v18  ;;  %132 = vst [vmem:[#allocation2 + $0x18] sm:$0xc] %v123_v20  ;;  %v2028_v23 = vpack.c.bf16 %v539_v22, %v534_v21  ;;  %v2517_v18 = vmul.u32.u64.low 3817748708, %v813_v15  ;;  %v2518_v20 = vmul.u32.u64.high 3817748708, %v813_v15, %v2517_v18 }
  0xd4   :  { %v823_v21 = vshrl.u32 %v2515_v17, 4 }
  0xd5   :  { %v173_v24 = vpop.permute.xlu1 %172  ;;  %v171_v25 = vpop.permute.xlu0 %170  ;;  %2029 = vmatpush1.bf16.msra.mxu0 %v2028_v23  ;;  %v834_v22 = vshrl.u32 %v2518_v20, 4 }
  0xd6   :  { %189 = vst.msk [vmem:[#allocation2 + $0x20] sm:$0x30] %vm188_vm11, %v173_v24  ;;  %v177_v26 = vsel %vm174_vm4, %v2413_v43, %v171_v25  ;;  %v178_v27 = vsel %vm174_vm4, %v171_v25, %v173_v24  ;;  %v545_v28 = vld [vmem:[#allocation2 + $0x58] sm:$0x7]  ;;  %v544_v30 = vld [vmem:[#allocation2 + $0x50] sm:$0x7] }
  0xd7   :  { %186 = vst [vmem:[#allocation2 + $0x10] sm:$0x30] %v177_v26  ;;  %187 = vst [vmem:[#allocation2 + $0x18] sm:$0x30] %v178_v27  ;;  %1987 = vmatprep.subr.msk.mxu0 %vm556_vm12, %v545_v28  ;;  %v824_v23 = vmul.u32 18, %v823_v21  ;;  %v835_v24 = vmul.u32 18, %v834_v22 }
  0xd9   :  { %v229_v31 = vpop.permute.xlu1 %228  ;;  %v227_v32 = vpop.permute.xlu0 %226  ;;  %1988 = vmatpush1.msk.msra.mxu0 %vm556_vm12, %v544_v30  ;;  %v825_v25 = vsub.s32 %v812_v14, %v824_v23  ;;  %v836_v26 = vsub.s32 %v813_v15, %v835_v24  ;;  %v814_v30 = vadd.s32 256, %v812_v14 }
  0xda   :  { %245 = vst.msk [vmem:[#allocation2 + $0x20] sm:$0xc0] %vm244_vm13, %v229_v31  ;;  %v233_v33 = vsel %vm230_vm2, %v2405_v37, %v227_v32  ;;  %v234_v34 = vsel %vm230_vm2, %v227_v32, %v229_v31  ;;  %1989 = vmatmul.mubr.msk.f32.vlgmr.msra.gmra.mrb[0].mxu0 %vm549_vm14, %v2452_v29  ;;  %v815_v31 = vadd.s32 384, %v812_v14 }
  0xdb   :  { %242 = vst [vmem:[#allocation2 + $0x10] sm:$0xc0] %v233_v33  ;;  %243 = vst [vmem:[#allocation2 + $0x18] sm:$0xc0] %v234_v34  ;;  %642 = vmatprep.mubr.f32.mxu0 %v2257_v19  ;;  %vm872_vm0 = vcmp.ne.s32.totalorder %v825_v25, 0  ;;  %v887_v0 = vadd.s32 18, %v825_v25 }
  0xdc   :  { %v888_v27 = vadd.s32 18, %v836_v26 }
  0xdd   :  { %v283_v36 = vpop.permute.xlu1 %282  ;;  %v281_v38 = vpop.permute.xlu0 %280 }
  0xde   :  { %298 = vst.msk [vmem:[#allocation2 + $0x48] sm:$0x3] %vm3011_vm1, %v283_v36  ;;  %v287_v39 = vsel %vm284_vm3, %v2409_v40, %v281_v38  ;;  %v288_v37 = vsel %vm284_vm3, %v281_v38, %v283_v36  ;;  %1990 = vmatmul.mubr.msk.f32.gmra.mrb[2].mxu0 %vm549_vm14, %v2462_v35 }
  0xdf   :  { %296 = vst [vmem:[#allocation2 + $0x38] sm:$0x3] %v287_v39  ;;  %297 = vst [vmem:[#allocation2 + $0x40] sm:$0x3] %v288_v37  ;;  %713 = vmatprep.mubr.f32.mxu0 %v2257_v19  ;;  %v2524_v38 = vmul.u32.u64.low 3817748708, %v814_v30  ;;  %v2525_v39 = vmul.u32.u64.high 3817748708, %v814_v30, %v2524_v38 }
  0xe1   :  { %v337_v41 = vpop.permute.xlu1 %336  ;;  %v335_v42 = vpop.permute.xlu0 %334  ;;  %v538_v8 = vld [vmem:[#allocation2 + $0x20] sm:$0xff] }
  0xe2   :  { %352 = vst.msk [vmem:[#allocation2 + $0x48] sm:$0xc] %vm133_vm10, %v337_v41  ;;  %v341_v43 = vsel %vm338_vm6, %v2419_v47, %v335_v42  ;;  %v342_v44 = vsel %vm338_vm6, %v335_v42, %v337_v41  ;;  %v537_v59 = vld [vmem:[#allocation2 + $0x18] sm:$0xff]  ;;  %v536_v62 = vld [vmem:[#allocation2 + $0x10] sm:$0xff]  ;;  %vm877_vm10 = vcmp.lt.s32.totalorder %v825_v25, 0 }
  0xe3   :  { %350 = vst [vmem:[#allocation2 + $0x38] sm:$0xc] %v341_v43  ;;  %351 = vst [vmem:[#allocation2 + $0x40] sm:$0xc] %v342_v44  ;;  %v2527_v42 = vmul.u32.u64.low 3817748708, %v815_v31  ;;  %v2528_v43 = vmul.u32.u64.high 3817748708, %v815_v31, %v2527_v42 }
  0xe5   :  { %v391_v40 = vpop.permute.xlu1 %390  ;;  %v389_v45 = vpop.permute.xlu0 %388 }
  0xe6   :  { %v397_v46 = vsel %vm3014_vm7, %v2423_v50, %v389_v45  ;;  %v398_v48 = vsel %vm3014_vm7, %v389_v45, %v391_v40 }
  0xe7   :  { %407 = vst [vmem:[#allocation2 + $0x38] sm:$0x30] %v397_v46  ;;  %408 = vst [vmem:[#allocation2 + $0x40] sm:$0x30] %v398_v48  ;;  %v816_v48 = vadd.s32 512, %v812_v14 }
  0xe9   :  { %v449_v49 = vpop.permute.xlu1 %448  ;;  %v447_v51 = vpop.permute.xlu0 %446 }
  0xea   :  { %v455_v52 = vsel %vm3013_vm8, %v2427_v53, %v447_v51  ;;  %v456_v47 = vsel %vm3013_vm8, %v447_v51, %v449_v49 }
  0xeb   :  { %465 = vst [vmem:[#allocation2 + $0x38] sm:$0xc0] %v455_v52  ;;  %466 = vst [vmem:[#allocation2 + $0x40] sm:$0xc0] %v456_v47  ;;  %v845_v47 = vshrl.u32 %v2525_v39, 4 }
  0xed   :  { %v506_v54 = vpop.permute.xlu1 %505  ;;  %v504_v55 = vpop.permute.xlu0 %503 }
  0xee   :  { %v512_v56 = vsel %vm3012_vm9, %v2438_v13, %v504_v55  ;;  %v513_v50 = vsel %vm3012_vm9, %v504_v55, %v506_v54  ;;  %v2509_v13 = vld [vmem:[#allocation3 + $0x58] sm:$0xff] }
  0xef   :  { %522 = vst [vmem:[#allocation2 + $0x60] sm:$0x3] %v512_v56  ;;  %523 = vst [vmem:[#allocation2 + $0x68] sm:$0x3] %v513_v50  ;;  %1403 = vrot.lane.b32.xlu0 %v2509_v13, %s2253_s14  ;;  %v856_v56 = vshrl.u32 %v2528_v43, 4  ;;  %v846_v50 = vmul.u32 18, %v845_v47 }
  0xf1   :  { %v451_v57 = vpop.permute.xlu1 %450  ;;  %v393_v58 = vpop.permute.xlu0 %392 }
  0xf2   :  { %v457_v60 = vsel %vm3013_vm8, %v449_v49, %v451_v57  ;;  %v399_v53 = vsel %vm3014_vm7, %v391_v40, %v393_v58  ;;  %v542_v61 = vld [vmem:[#allocation2 + $0x40] sm:$0xff]  ;;  %v541_v63 = vld [vmem:[#allocation2 + $0x38] sm:$0xff]  ;;  %v857_v57 = vmul.u32 18, %v856_v56  ;;  %v847_v58 = vsub.s32 %v814_v30, %v846_v50 }
  0xf3   :  { %467 = vst.msk [vmem:[#allocation2 + $0x48] sm:$0xc0] %vm244_vm13, %v457_v60  ;;  %v2030_v1 = vpack.c.bf16 %v542_v61, %v537_v59  ;;  %v2032_v2 = vpack.c.bf16 %v541_v63, %v536_v62  ;;  %vm882_vm13 = vmand %vm877_vm10, %vm872_vm0 }
  0xf4   :  { %409 = vst.msk [vmem:[#allocation2 + $0x48] sm:$0x30] %vm188_vm11, %v399_v53  ;;  %vm873_vm11 = vcmp.ne.s32.totalorder %v836_v26, 0  ;;  %v892_v28 = vsel %vm882_vm13, %v887_v0, %v825_v25  ;;  %v858_v60 = vsub.s32 %v815_v31, %v857_v57  ;;  %vm879_vm0 = vcmp.lt.s32.totalorder %v847_v58, 0 }
  0xf5   :  { %v508_v3 = vpop.permute.xlu0 %507  ;;  %2031 = vmatprep.subr.bf16.mxu0 %v2030_v1  ;;  %vm897_vm15 = vcmp.lt.s32.totalorder %v892_v28, 16  ;;  %v889_v61 = vadd.s32 18, %v847_v58 }
  0xf6   :  { %v514_v4 = vsel %vm3012_vm9, %v506_v54, %v508_v3  ;;  %2033 = vmatpush1.bf16.msra.mxu0 %v2032_v2  ;;  %v547_v6 = vld [vmem:[#allocation2 + $0x68] sm:$0x7]  ;;  %v546_v7 = vld [vmem:[#allocation2 + $0x60] sm:$0x7]  ;;  %v1998_v33 = vsel %vm897_vm15, 1.0, %v2257_v19  ;;  %vm875_vm10 = vcmp.ne.s32.totalorder %v858_v60, 0 }
  0xf7   :  { %524 = vst.msk [vmem:[#allocation2 + $0x70] sm:$0x3] %vm3011_vm1, %v514_v4  ;;  %1991 = vmatprep.subr.msk.mxu0 %vm556_vm12, %v547_v6  ;;  %v2533_v54 = vmul.u32.u64.low 3817748708, %v816_v48  ;;  %v2534_v55 = vmul.u32.u64.high 3817748708, %v816_v48, %v2533_v54  ;;  %v890_v62 = vadd.s32 18, %v858_v60 }
  0xf9   :  { %v867_v59 = vshrl.u32 %v2534_v55, 4 }
  0xfa   :  { %1992 = vmatpush1.msk.msra.mxu0 %vm556_vm12, %v546_v7 }
  0xfb   :  { %v543_v9 = vld [vmem:[#allocation2 + $0x48] sm:$0xff]  ;;  %1993 = vmatmul.mubr.msk.f32.vlgmr.msra.gmra.mrb[4].mxu0 %vm549_vm14, %v2452_v29  ;;  %v868_v53 = vmul.u32 18, %v867_v59 }
  0xfc   :  { %v2034_v10 = vpack.c.bf16 %v543_v9, %v538_v8  ;;  %719 = vmatprep.mubr.f32.mxu0 %v2257_v19 }
  0xfd   :  { %v869_v63 = vsub.s32 %v816_v48, %v868_v53 }
  0xfe   :  { %2035 = vmatprep.subr.bf16.mxu0 %v2034_v10  ;;  %v548_v11 = vld [vmem:[#allocation2 + $0x70] sm:$0x7] }
  0xff   :  { %2037 = vmatpush3.bf16.msra.mxu0 %v2034_v10  ;;  %vm881_vm15 = vcmp.lt.s32.totalorder %v869_v63, 0  ;;  %v891_v3 = vadd.s32 18, %v869_v63 }
 0x100   :  { %1994 = vmatmul.mubr.msk.f32.gmra.mrb[6].mxu0 %vm549_vm14, %v2462_v35  ;;  %2021 = vmatprep.subr.msk.mxu0 %vm556_vm12, %v548_v11 }
 0x101   :  { %2023 = vmatprep.mubr.msk.f32.mxu0 %vm549_vm14, %v2452_v29 }
 0x103   :  { %2022 = vmatpush3.msk.msra.mxu0 %vm556_vm12, %v548_v11  ;;  %vm878_vm12 = vcmp.lt.s32.totalorder %v836_v26, 0 }
 0x104   :  { %2024 = vmatmul.mubr.msk.f32.vlgmr.msra.gmra.mrb[8].mxu0 %vm549_vm14, %v2462_v35  ;;  %vm883_vm14 = vmand %vm878_vm12, %vm873_vm11  ;;  %vm880_vm11 = vcmp.lt.s32.totalorder %v858_v60, 0 }
 0x105   :  { %v893_v29 = vsel %vm883_vm14, %v888_v27, %v836_v26  ;;  %vm885_vm13 = vmand %vm880_vm11, %vm875_vm10  ;;  %vm876_vm14 = vcmp.ne.s32.totalorder %v869_v63, 0  ;;  %vm1700_vm10 = vcmask 138240   ;;  %vm3015_vm11 = vcmask 457728  }
 0x106   :  { %vm898_vm1 = vcmp.lt.s32.totalorder %v893_v29, 16  ;;  %v895_v2 = vsel %vm885_vm13, %v890_v62, %v858_v60  ;;  %vm886_vm7 = vmand %vm881_vm15, %vm876_vm14  ;;  %vm3018_vm14 = vcmask 441344  }
 0x107   :  { %v1999_v36 = vsel %vm898_vm1, 1.0, %v2257_v19  ;;  %vm874_vm1 = vcmp.ne.s32.totalorder %v847_v58, 0  ;;  %vm900_vm8 = vcmp.lt.s32.totalorder %v895_v2, 16  ;;  %v896_v11 = vsel %vm886_vm7, %v891_v3, %v869_v63  ;;  %vm3017_vm13 = vmmov %vm3015_vm11 }
 0x108   :  { %vm884_vm12 = vmand %vm879_vm0, %vm874_vm1  ;;  %v2001_v10 = vsel %vm900_vm8, 1.0, %v2257_v19  ;;  %vm901_vm1 = vcmp.lt.s32.totalorder %v896_v11, 16  ;;  %vm984_vm7 = vcmask 1047848   ;;  %vm965_vm8 = vcmask 302080  }
 0x109   :  { %v894_v1 = vsel %vm884_vm12, %v889_v61, %v847_v58  ;;  %v2002_v23 = vsel %vm901_vm1, 1.0, %v2257_v19  ;;  %vm1010_vm0 = vcmask 523264   ;;  %v2643_v58 = vld.sshfl [vmem:[%s3009_s2] sm:$0x33 pattern:$0x76325410]  ;;  %vm3020_vm1 = vmmov %vm3018_vm14 }
 0x10a   :  { %vm899_vm9 = vcmp.lt.s32.totalorder %v894_v1, 16  ;;  %v2649_v59 = vcombine.high %v2643_v58, %v2643_v58  ;;  %vm3016_vm12 = vcmask 449536   ;;  %s2260_s2 = smov [#allocation10]  }
 0x10b   :  { %v2000_v6 = vsel %vm899_vm9, 1.0, %v2257_v19  ;;  %vm989_vm9 = vcmask 826368   ;;  %vm3019_vm15 = vmmov %vm3016_vm12  ;;  %s1970_s20 = sshll.u32 %s2260_s2, 4  ;;  %s1971_s20 = int_to_ptr.vmem [resolvable:$true] %s1970_s20 }
 0x10c   :  { %2006 = vmatprep.mubr.msk.f32.mxu1 %vm1700_vm10, %v2649_v59  ;;  %2009 = vmatprep.mubr.msk.f32.mxu0 %vm1700_vm10, %v2649_v59  ;;  %s2215_s21 = scalar_lea.vmem %s1971_s20, 160  ;;  %p2220_p3 = scmp.lt.s32.totalorder %s1971_s20, %s1971_s20 }
 0x10d   :  { %p2216_p2 = scmp.ne.s32.totalorder %s1971_s20, %s2215_s21  ;;  %p2221_p4 = scmp.lt.s32.totalorder %s2215_s21, %s2215_s21 }
 0x10f   :  { %p2222_p5 = por %p2221_p4, %p2220_p3 }
 0x111   :  { %p2223_p6 = pnand %p2222_p5, %p2216_p2 }
 0x141   :  { %v2549_v29 = vpop.permute.xlu1 %1391 }
 0x161   :  { %v2551_v30 = vpop.permute.xlu0 %1403 }
 0x1ad   :  { %v638_v32 = vpop.f32.mrb[0].mxu0 }
 0x1ae   :  { %v801_v34 = vmax.f32 %v638_v32, 0.0  ;;  %v640_v35 = vpop.f32.mrb[1].mxu0 }
 0x1af   :  { %v802_v37 = vmax.f32 %v640_v35, 0.0 }
 0x1b0   :  { %v925_v41 = vmul.f32 %v1998_v33, %v801_v34 }
 0x1b1   :  { %v926_v44 = vmul.f32 %v1999_v36, %v802_v37  ;;  %v644_v40 = vpop.f32.mrb[2].mxu0 }
 0x1b2   :  { %v806_v45 = vmax.f32 %v644_v40, 0.0  ;;  %945 = vrot.lane.b32.xlu1 %v925_v41, %s2258_s17  ;;  %v646_v46 = vpop.f32.mrb[3].mxu0 }
 0x1b3   :  { %v807_v49 = vmax.f32 %v646_v46, 0.0  ;;  %947 = vrot.lane.b32.xlu0 %v926_v44, %s2258_s17 }
 0x1b4   :  { %v930_v51 = vmul.f32 %v1998_v33, %v806_v45 }
 0x1b5   :  { %v931_v52 = vmul.f32 %v1999_v36, %v807_v49 }
 0x1b7   :  { %955 = vrot.lane.b32.xlu0 %v930_v51, %s2258_s17  ;;  %957 = vrot.lane.b32.xlu1 %v931_v52, %s2258_s17 }
 0x1ce   :  { %v715_v4 = vpop.f32.mrb[4].mxu0 }
 0x1cf   :  { %v803_v7 = vmax.f32 %v715_v4, 0.0  ;;  %v717_v8 = vpop.f32.mrb[5].mxu0 }
 0x1d0   :  { %v804_v9 = vmax.f32 %v717_v8, 0.0 }
 0x1d1   :  { %v927_v14 = vmul.f32 %v2000_v6, %v803_v7 }
 0x1d2   :  { %v928_v16 = vmul.f32 %v2001_v10, %v804_v9 }
 0x1d3   :  { %v721_v15 = vpop.f32.mrb[6].mxu0  ;;  %949 = vrot.lane.b32.xlu1 %v927_v14, %s2258_s17 }
 0x1d4   :  { %v808_v17 = vmax.f32 %v721_v15, 0.0  ;;  %v723_v18 = vpop.f32.mrb[7].mxu0 }
 0x1d5   :  { %v809_v20 = vmax.f32 %v723_v18, 0.0 }
 0x1d6   :  { %v932_v21 = vmul.f32 %v2000_v6, %v808_v17 }
 0x1d7   :  { %v2025_v22 = vpop.f32.mrb[8].mxu0  ;;  %v933_v24 = vmul.f32 %v2001_v10, %v809_v20  ;;  %951 = vrot.lane.b32.xlu1 %v928_v16, %s2258_s17 }
 0x1d8   :  { %v810_v25 = vmax.f32 %v2025_v22, 0.0  ;;  %959 = vrot.lane.b32.xlu0 %v932_v21, %s2258_s17  ;;  %v792_v26 = vpop.f32.mrb[9].mxu0 }
 0x1d9   :  { %v805_v0 = vmax.f32 %v792_v26, 0.0 }
 0x1da   :  { %v934_v27 = vmul.f32 %v2002_v23, %v810_v25 }
 0x1db   :  { %v929_v28 = vmul.f32 %v2002_v23, %v805_v0  ;;  %961 = vrot.lane.b32.xlu1 %v933_v24, %s2258_s17 }
 0x1dc   :  { %963 = vrot.lane.b32.xlu0 %v934_v27, %s2258_s17 }
 0x1e0   :  { %953 = vrot.lane.b32.xlu0 %v929_v28, %s2258_s17 }
 0x224   :  { %v946_v31 = vpop.permute.xlu1 %945 }
 0x225   :  { %985 = vst.msk [vmem:[#allocation3] sm:$0xff] %vm984_vm7, %v946_v31  ;;  %v948_v32 = vpop.permute.xlu0 %947 }
 0x226   :  { %v2554_v33 = vsel %vm965_vm8, %v946_v31, %v948_v32 }
 0x229   :  { %v956_v34 = vpop.permute.xlu0 %955  ;;  %v958_v35 = vpop.permute.xlu1 %957 }
 0x22a   :  { %991 = vst.msk [vmem:[#allocation3 + $0x30] sm:$0xff] %vm984_vm7, %v956_v34  ;;  %v2557_v36 = vsel %vm965_vm8, %v956_v34, %v958_v35  ;;  %vm3021_vm7 = vmmov %vm3015_vm11 }
 0x22b   :  { %v2038_v38 = vpack.c.bf16 %v2557_v36, %v2554_v33 }
 0x22c   :  { %v1017_v39 = vld [vmem:[#allocation3] sm:$0xff] }
 0x22d   :  { %1037 = vrot.lane.b32.xlu1 %v1017_v39, %s2249_s10  ;;  %2039 = vmatprep.subr.bf16.mxu1 %v2038_v38 }
 0x231   :  { %1105 = vrot.lane.b32.xlu1 %v1017_v39, %s2248_s1  ;;  %v1022_v37 = vld [vmem:[#allocation3 + $0x30] sm:$0xff] }
 0x232   :  { %1047 = vrot.lane.b32.xlu0 %v1022_v37, %s2249_s10  ;;  %v2040_v41 = vpack.c.bf16 %v1022_v37, %v1017_v39 }
 0x234   :  { %2041 = vmatpush1.bf16.msra.mxu1 %v2040_v41 }
 0x235   :  { %1173 = vrot.lane.b32.xlu1 %v1017_v39, %s2250_s11 }
 0x236   :  { %1115 = vrot.lane.b32.xlu0 %v1022_v37, %s2248_s1 }
 0x239   :  { %1241 = vrot.lane.b32.xlu1 %v1017_v39, %s2251_s12 }
 0x23a   :  { %1183 = vrot.lane.b32.xlu0 %v1022_v37, %s2250_s11 }
 0x23d   :  { %1309 = vrot.lane.b32.xlu1 %v1017_v39, %s2252_s13 }
 0x23e   :  { %1251 = vrot.lane.b32.xlu0 %v1022_v37, %s2251_s12 }
 0x241   :  { %1381 = vrot.lane.b32.xlu1 %v1017_v39, %s2253_s14 }
 0x242   :  { %1319 = vrot.lane.b32.xlu0 %v1022_v37, %s2252_s13 }
 0x245   :  { %v950_v42 = vpop.permute.xlu1 %949  ;;  %1459 = vrot.lane.b32.xlu1 %v1017_v39, %s2254_s15 }
 0x246   :  { %v967_v43 = vsel %vm965_vm8, %v948_v32, %v950_v42  ;;  %1393 = vrot.lane.b32.xlu0 %v1022_v37, %s2253_s14 }
 0x249   :  { %v952_v44 = vpop.permute.xlu1 %951  ;;  %1537 = vrot.lane.b32.xlu1 %v1017_v39, %s2256_s16 }
 0x24a   :  { %v960_v40 = vpop.permute.xlu0 %959  ;;  %v2577_v45 = vsel %vm965_vm8, %v950_v42, %v952_v44  ;;  %1471 = vrot.lane.b32.xlu0 %v1022_v37, %s2254_s15 }
 0x24b   :  { %v971_v46 = vsel %vm965_vm8, %v958_v35, %v960_v40 }
 0x24c   :  { %v2076_v54 = vpack.c.bf16 %v971_v46, %v967_v43 }
 0x24d   :  { %1039 = vrot.lane.b32.xlu1 %v2554_v33, %s2249_s10  ;;  %v962_v48 = vpop.permute.xlu1 %961 }
 0x24e   :  { %v964_v49 = vpop.permute.xlu0 %963  ;;  %v2584_v51 = vsel %vm965_vm8, %v960_v40, %v962_v48  ;;  %1549 = vrot.lane.b32.xlu0 %v1022_v37, %s2256_s16 }
 0x24f   :  { %v973_v52 = vsel %vm965_vm8, %v962_v48, %v964_v49  ;;  %v2074_v47 = vpack.c.bf16 %v2584_v51, %v2577_v45 }
 0x250   :  { %995 = vst.msk [vmem:[#allocation3 + $0x50] sm:$0xff] %vm989_vm9, %v973_v52 }
 0x251   :  { %1107 = vrot.lane.b32.xlu1 %v2554_v33, %s2248_s1  ;;  %2075 = vmatprep.subr.bf16.mxu0 %v2074_v47 }
 0x252   :  { %v954_v55 = vpop.permute.xlu0 %953  ;;  %1041 = vrot.lane.b32.xlu0 %v967_v43, %s2249_s10  ;;  %2077 = vmatpush1.bf16.msra.mxu0 %v2076_v54 }
 0x253   :  { %v969_v56 = vsel %vm965_vm8, %v952_v44, %v954_v55  ;;  %vm3022_vm8 = vmmov %vm3016_vm12 }
 0x254   :  { %990 = vst.msk [vmem:[#allocation3 + $0x20] sm:$0xff] %vm989_vm9, %v969_v56  ;;  %vm3023_vm9 = vmmov %vm3021_vm7 }
 0x255   :  { %1175 = vrot.lane.b32.xlu1 %v2554_v33, %s2250_s11 }
 0x256   :  { %1109 = vrot.lane.b32.xlu0 %v967_v43, %s2248_s1 }
 0x257   :  { %v1005_v50 = vld [vmem:[#allocation3 + $0x50] sm:$0xff] }
 0x258   :  { %1016 = vst.msk [vmem:[#allocation4 + $0x48] sm:$0xff] %vm1010_vm0, %v1005_v50 }
 0x259   :  { %1243 = vrot.lane.b32.xlu1 %v2554_v33, %s2251_s12 }
 0x25a   :  { %1177 = vrot.lane.b32.xlu0 %v967_v43, %s2250_s11 }
 0x25b   :  { %v2602_v57 = vld [vmem:[#allocation3 + $0x20] sm:$0xff] }
 0x25c   :  { %1011 = vst.msk [vmem:[#allocation4 + $0x20] sm:$0xff] %vm1010_vm0, %v2602_v57 }
 0x25d   :  { %1311 = vrot.lane.b32.xlu1 %v2554_v33, %s2252_s13 }
 0x25e   :  { %1245 = vrot.lane.b32.xlu0 %v967_v43, %s2251_s12 }
 0x261   :  { %1383 = vrot.lane.b32.xlu1 %v2554_v33, %s2253_s14 }
 0x262   :  { %1313 = vrot.lane.b32.xlu0 %v967_v43, %s2252_s13 }
 0x265   :  { %1461 = vrot.lane.b32.xlu1 %v2554_v33, %s2254_s15 }
 0x266   :  { %1385 = vrot.lane.b32.xlu0 %v967_v43, %s2253_s14 }
 0x269   :  { %1539 = vrot.lane.b32.xlu1 %v2554_v33, %s2256_s16 }
 0x26a   :  { %1463 = vrot.lane.b32.xlu0 %v967_v43, %s2254_s15 }
 0x26d   :  { %1049 = vrot.lane.b32.xlu1 %v2557_v36, %s2249_s10 }
 0x26e   :  { %1541 = vrot.lane.b32.xlu0 %v967_v43, %s2256_s16 }
 0x271   :  { %1117 = vrot.lane.b32.xlu1 %v2557_v36, %s2248_s1 }
 0x272   :  { %1051 = vrot.lane.b32.xlu0 %v971_v46, %s2249_s10 }
 0x275   :  { %1185 = vrot.lane.b32.xlu1 %v2557_v36, %s2250_s11 }
 0x276   :  { %1119 = vrot.lane.b32.xlu0 %v971_v46, %s2248_s1 }
 0x279   :  { %1253 = vrot.lane.b32.xlu1 %v2557_v36, %s2251_s12 }
 0x27a   :  { %1187 = vrot.lane.b32.xlu0 %v971_v46, %s2250_s11 }
 0x27d   :  { %1321 = vrot.lane.b32.xlu1 %v2557_v36, %s2252_s13 }
 0x27e   :  { %1255 = vrot.lane.b32.xlu0 %v971_v46, %s2251_s12 }
 0x281   :  { %1395 = vrot.lane.b32.xlu1 %v2557_v36, %s2253_s14 }
 0x282   :  { %1323 = vrot.lane.b32.xlu0 %v971_v46, %s2252_s13 }
 0x285   :  { %1473 = vrot.lane.b32.xlu1 %v2557_v36, %s2254_s15 }
 0x286   :  { %1397 = vrot.lane.b32.xlu0 %v971_v46, %s2253_s14 }
 0x289   :  { %1551 = vrot.lane.b32.xlu1 %v2557_v36, %s2256_s16 }
 0x28a   :  { %1475 = vrot.lane.b32.xlu0 %v971_v46, %s2254_s15 }
 0x28d   :  { %1043 = vrot.lane.b32.xlu1 %v2577_v45, %s2249_s10 }
 0x28e   :  { %1553 = vrot.lane.b32.xlu0 %v971_v46, %s2256_s16 }
 0x291   :  { %1111 = vrot.lane.b32.xlu1 %v2577_v45, %s2248_s1 }
 0x292   :  { %1055 = vrot.lane.b32.xlu0 %v1005_v50, %s2249_s10 }
 0x295   :  { %1179 = vrot.lane.b32.xlu1 %v2577_v45, %s2250_s11 }
 0x296   :  { %1123 = vrot.lane.b32.xlu0 %v1005_v50, %s2248_s1 }
 0x299   :  { %1247 = vrot.lane.b32.xlu1 %v2577_v45, %s2251_s12 }
 0x29a   :  { %1191 = vrot.lane.b32.xlu0 %v1005_v50, %s2250_s11 }
 0x29d   :  { %1315 = vrot.lane.b32.xlu1 %v2577_v45, %s2252_s13 }
 0x29e   :  { %1259 = vrot.lane.b32.xlu0 %v1005_v50, %s2251_s12 }
 0x29f   :  { %v1038_v60 = vpop.permute.xlu1 %1037 }
 0x2a1   :  { %1387 = vrot.lane.b32.xlu1 %v2577_v45, %s2253_s14 }
 0x2a2   :  { %1327 = vrot.lane.b32.xlu0 %v1005_v50, %s2252_s13 }
 0x2a3   :  { %v1106_v53 = vpop.permute.xlu1 %1105 }
 0x2a4   :  { %v2674_v61 = vpop.permute.xlu0 %1047 }
 0x2a5   :  { %1465 = vrot.lane.b32.xlu1 %v2577_v45, %s2254_s15 }
 0x2a6   :  { %1401 = vrot.lane.b32.xlu0 %v1005_v50, %s2253_s14 }
 0x2a7   :  { %v1174_v62 = vpop.permute.xlu1 %1173 }
 0x2a8   :  { %v2679_v63 = vpop.permute.xlu0 %1115 }
 0x2a9   :  { %1543 = vrot.lane.b32.xlu1 %v2577_v45, %s2256_s16 }
 0x2aa   :  { %1479 = vrot.lane.b32.xlu0 %v1005_v50, %s2254_s15 }
 0x2ab   :  { %v1242_v1 = vpop.permute.xlu1 %1241 }
 0x2ac   :  { %v2684_v2 = vpop.permute.xlu0 %1183 }
 0x2ad   :  { %1053 = vrot.lane.b32.xlu1 %v2584_v51, %s2249_s10 }
 0x2ae   :  { %1557 = vrot.lane.b32.xlu0 %v1005_v50, %s2256_s16 }
 0x2af   :  { %v1310_v3 = vpop.permute.xlu1 %1309 }
 0x2b0   :  { %v2689_v4 = vpop.permute.xlu0 %1251 }
 0x2b1   :  { %1121 = vrot.lane.b32.xlu1 %v2584_v51, %s2248_s1 }
 0x2b2   :  { %1045 = vrot.lane.b32.xlu0 %v2602_v57, %s2249_s10 }
 0x2b3   :  { %v1382_v6 = vpop.permute.xlu1 %1381 }
 0x2b4   :  { %v2695_v7 = vpop.permute.xlu0 %1319 }
 0x2b5   :  { %1189 = vrot.lane.b32.xlu1 %v2584_v51, %s2250_s11 }
 0x2b6   :  { %1113 = vrot.lane.b32.xlu0 %v2602_v57, %s2248_s1 }
 0x2b7   :  { %v1460_v8 = vpop.permute.xlu1 %1459 }
 0x2b8   :  { %v2701_v9 = vpop.permute.xlu0 %1393 }
 0x2b9   :  { %1257 = vrot.lane.b32.xlu1 %v2584_v51, %s2251_s12 }
 0x2ba   :  { %1181 = vrot.lane.b32.xlu0 %v2602_v57, %s2250_s11 }
 0x2bb   :  { %v1538_v10 = vpop.permute.xlu1 %1537 }
 0x2bc   :  { %v2707_v11 = vpop.permute.xlu0 %1471 }
 0x2bd   :  { %1325 = vrot.lane.b32.xlu1 %v2584_v51, %s2252_s13 }
 0x2be   :  { %1249 = vrot.lane.b32.xlu0 %v2602_v57, %s2251_s12 }
 0x2bf   :  { %v1040_v14 = vpop.permute.xlu1 %1039 }
 0x2c0   :  { %v1057_v15 = vsel %vm119_vm5, %v1038_v60, %v1040_v14  ;;  %v2714_v16 = vpop.permute.xlu0 %1549 }
 0x2c1   :  { %1399 = vrot.lane.b32.xlu1 %v2584_v51, %s2253_s14 }
 0x2c2   :  { %1317 = vrot.lane.b32.xlu0 %v2602_v57, %s2252_s13 }
 0x2c3   :  { %v1108_v17 = vpop.permute.xlu1 %1107 }
 0x2c4   :  { %v1125_v18 = vsel %vm174_vm4, %v1106_v53, %v1108_v17  ;;  %v2721_v20 = vpop.permute.xlu0 %1041 }
 0x2c5   :  { %v1058_v21 = vsel %vm119_vm5, %v1040_v14, %v2721_v20  ;;  %1477 = vrot.lane.b32.xlu1 %v2584_v51, %s2254_s15 }
 0x2c6   :  { %1389 = vrot.lane.b32.xlu0 %v2602_v57, %s2253_s14 }
 0x2c7   :  { %v1176_v22 = vpop.permute.xlu1 %1175 }
 0x2c8   :  { %v1193_v23 = vsel %vm230_vm2, %v1174_v62, %v1176_v22  ;;  %v2730_v24 = vpop.permute.xlu0 %1109 }
 0x2c9   :  { %v1126_v25 = vsel %vm174_vm4, %v1108_v17, %v2730_v24  ;;  %1555 = vrot.lane.b32.xlu1 %v2584_v51, %s2256_s16 }
 0x2ca   :  { %1467 = vrot.lane.b32.xlu0 %v2602_v57, %s2254_s15 }
 0x2cb   :  { %v1244_v26 = vpop.permute.xlu1 %1243 }
 0x2cc   :  { %v2739_v0 = vsel %vm284_vm3, %v1242_v1, %v1244_v26  ;;  %v2741_v27 = vpop.permute.xlu0 %1177 }
 0x2cd   :  { %v1194_v28 = vsel %vm230_vm2, %v1176_v22, %v2741_v27  ;;  %1469 = vrot.lane.b32.xlu1 %v2505_v12, %s2254_s15 }
 0x2ce   :  { %1545 = vrot.lane.b32.xlu0 %v2602_v57, %s2256_s16 }
 0x2cf   :  { %v1312_v31 = vpop.permute.xlu1 %1311 }
 0x2d0   :  { %v2750_v32 = vsel %vm338_vm6, %v1310_v3, %v1312_v31  ;;  %v2752_v33 = vpop.permute.xlu0 %1245 }
 0x2d1   :  { %v1262_v34 = vsel %vm284_vm3, %v1244_v26, %v2752_v33  ;;  %1547 = vrot.lane.b32.xlu1 %v2505_v12, %s2256_s16 }
 0x2d2   :  { %1481 = vrot.lane.b32.xlu0 %v2509_v13, %s2254_s15 }
 0x2d3   :  { %v1384_v35 = vpop.permute.xlu1 %1383 }
 0x2d4   :  { %v2761_v36 = vsel %vm3015_vm11, %v1382_v6, %v1384_v35  ;;  %v2763_v38 = vpop.permute.xlu0 %1313  ;;  %vm3024_vm11 = vmmov %vm3020_vm1 }
 0x2d5   :  { %v1330_v39 = vsel %vm338_vm6, %v1312_v31, %v2763_v38 }
 0x2d6   :  { %1559 = vrot.lane.b32.xlu0 %v2509_v13, %s2256_s16 }
 0x2d7   :  { %v1462_v37 = vpop.permute.xlu1 %1461 }
 0x2d8   :  { %v2770_v41 = vsel %vm3016_vm12, %v1460_v8, %v1462_v37  ;;  %v2772_v12 = vpop.permute.xlu0 %1385  ;;  %vm3025_vm12 = vmmov %vm3022_vm8 }
 0x2d9   :  { %v1406_v42 = vsel %vm3017_vm13, %v1384_v35, %v2772_v12  ;;  %vm3026_vm13 = vmmov %vm3020_vm1 }
 0x2db   :  { %v1540_v43 = vpop.permute.xlu1 %1539 }
 0x2dc   :  { %v2777_v44 = vsel %vm3018_vm14, %v1538_v10, %v1540_v43  ;;  %v2779_v40 = vpop.permute.xlu0 %1463  ;;  %vm1703_vm14 = vcmask 1040384  }
 0x2dd   :  { %v1484_v45 = vsel %vm3019_vm15, %v1462_v37, %v2779_v40  ;;  %vm3028_vm15 = vmmov %vm3022_vm8 }
 0x2df   :  { %v1050_v46 = vpop.permute.xlu1 %1049 }
 0x2e0   :  { %v1061_v13 = vsel %vm119_vm5, %v2674_v61, %v1050_v46  ;;  %v2785_v48 = vpop.permute.xlu0 %1541 }
 0x2e1   :  { %v2789_v49 = vsel %vm3020_vm1, %v1540_v43, %v2785_v48  ;;  %v2044_v50 = vpack.c.bf16 %v1061_v13, %v1057_v15  ;;  %vm3029_vm1 = vmmov %vm3021_vm7 }
 0x2e3   :  { %v1118_v51 = vpop.permute.xlu1 %1117 }
 0x2e4   :  { %v1129_v52 = vsel %vm174_vm4, %v2679_v63, %v1118_v51  ;;  %v2793_v47 = vpop.permute.xlu0 %1051 }
 0x2e5   :  { %v1062_v54 = vsel %vm119_vm5, %v1050_v46, %v2793_v47  ;;  %v2048_v63 = vpack.c.bf16 %v1129_v52, %v1125_v18 }
 0x2e6   :  { %v2042_v55 = vpack.c.bf16 %v1062_v54, %v1058_v21  ;;  %v1686_v54 = vld [vmem:[#allocation4 + $0x2d8] sm:$0x1] }
 0x2e7   :  { %v1186_v56 = vpop.permute.xlu1 %1185 }
 0x2e8   :  { %v1197_v57 = vsel %vm230_vm2, %v2684_v2, %v1186_v56  ;;  %v2799_v60 = vpop.permute.xlu0 %1119  ;;  %2043 = vmatprep.subr.bf16.mxu1 %v2042_v55  ;;  %v1685_v55 = vld [vmem:[#allocation4 + $0x2d0] sm:$0x1] }
 0x2e9   :  { %v1130_v53 = vsel %vm174_vm4, %v1118_v51, %v2799_v60  ;;  %2045 = vmatpush1.bf16.msra.mxu1 %v2044_v50  ;;  %v2052_v10 = vpack.c.bf16 %v1197_v57, %v1193_v23 }
 0x2ea   :  { %v2046_v61 = vpack.c.bf16 %v1130_v53, %v1126_v25  ;;  %v2259_v53 = vmov 0.0|0.0  }
 0x2eb   :  { %v1254_v62 = vpop.permute.xlu1 %1253 }
 0x2ec   :  { %v1265_v1 = vsel %vm284_vm3, %v2689_v4, %v1254_v62  ;;  %v2805_v3 = vpop.permute.xlu0 %1187  ;;  %2047 = vmatprep.subr.bf16.mxu1 %v2046_v61 }
 0x2ed   :  { %v1198_v6 = vsel %vm230_vm2, %v1186_v56, %v2805_v3  ;;  %2049 = vmatpush1.bf16.msra.mxu1 %v2048_v63  ;;  %v2056_v21 = vpack.c.bf16 %v1265_v1, %v2739_v0  ;;  %v1604_v56 = vld [vmem:[#allocation4 + $0x48] sm:$0xff] }
 0x2ee   :  { %v2050_v2 = vpack.c.bf16 %v1198_v6, %v1194_v28 }
 0x2ef   :  { %v1322_v8 = vpop.permute.xlu1 %1321 }
 0x2f0   :  { %v1333_v14 = vsel %vm338_vm6, %v2695_v7, %v1322_v8  ;;  %v2811_v15 = vpop.permute.xlu0 %1255  ;;  %2051 = vmatprep.subr.bf16.mxu1 %v2050_v2 }
 0x2f1   :  { %v1266_v17 = vsel %vm284_vm3, %v1254_v62, %v2811_v15  ;;  %2053 = vmatpush1.bf16.msra.mxu1 %v2052_v10  ;;  %v2060_v28 = vpack.c.bf16 %v1333_v14, %v2750_v32 }
 0x2f2   :  { %v2054_v4 = vpack.c.bf16 %v1266_v17, %v1262_v34 }
 0x2f3   :  { %v1396_v18 = vpop.permute.xlu1 %1395 }
 0x2f4   :  { %v1410_v22 = vsel %vm3021_vm7, %v2701_v9, %v1396_v18  ;;  %v2818_v25 = vpop.permute.xlu0 %1323  ;;  %2055 = vmatprep.subr.bf16.mxu1 %v2054_v4 }
 0x2f5   :  { %v1334_v7 = vsel %vm338_vm6, %v1322_v8, %v2818_v25  ;;  %2057 = vmatpush1.bf16.msra.mxu1 %v2056_v21  ;;  %v2064_v37 = vpack.c.bf16 %v1410_v22, %v2761_v36 }
 0x2f6   :  { %v2058_v23 = vpack.c.bf16 %v1334_v7, %v1330_v39 }
 0x2f7   :  { %v1474_v26 = vpop.permute.xlu1 %1473 }
 0x2f8   :  { %v1488_v31 = vsel %vm3022_vm8, %v2707_v11, %v1474_v26  ;;  %v2825_v34 = vpop.permute.xlu0 %1397  ;;  %2059 = vmatprep.subr.bf16.mxu1 %v2058_v23 }
 0x2f9   :  { %v1411_v9 = vsel %vm3023_vm9, %v1396_v18, %v2825_v34  ;;  %2061 = vmatpush1.bf16.msra.mxu1 %v2060_v28  ;;  %v2068_v13 = vpack.c.bf16 %v1488_v31, %v2770_v41 }
 0x2fa   :  { %v2062_v0 = vpack.c.bf16 %v1411_v9, %v1406_v42 }
 0x2fb   :  { %v1552_v35 = vpop.permute.xlu1 %1551 }
 0x2fc   :  { %v1566_v39 = vsel %vm3024_vm11, %v2714_v16, %v1552_v35  ;;  %v2832_v43 = vpop.permute.xlu0 %1475  ;;  %2063 = vmatprep.subr.bf16.mxu1 %v2062_v0 }
 0x2fd   :  { %v1489_v11 = vsel %vm3025_vm12, %v1474_v26, %v2832_v43  ;;  %2065 = vmatpush1.bf16.msra.mxu1 %v2064_v37 }
 0x2fe   :  { %v2066_v32 = vpack.c.bf16 %v1489_v11, %v1484_v45  ;;  %v2072_v45 = vpack.c.bf16 %v1566_v39, %v2777_v44 }
 0x2ff   :  { %v1044_v46 = vpop.permute.xlu1 %1043 }
 0x300   :  { %v2839_v42 = vsel %vm119_vm5, %v2721_v20, %v1044_v46  ;;  %v2841_v51 = vpop.permute.xlu0 %1553  ;;  %2067 = vmatprep.subr.bf16.mxu1 %v2066_v32 }
 0x301   :  { %v1567_v16 = vsel %vm3026_vm13, %v1552_v35, %v2841_v51  ;;  %2069 = vmatpush1.bf16.msra.mxu1 %v2068_v13 }
 0x302   :  { %v2070_v36 = vpack.c.bf16 %v1567_v16, %v2789_v49  ;;  %v1599_v49 = vld [vmem:[#allocation4 + $0x20] sm:$0xff] }
 0x303   :  { %v2846_v52 = vpop.permute.xlu1 %1111 }
 0x304   :  { %v2852_v20 = vsel %vm174_vm4, %v2730_v24, %v2846_v52  ;;  %v1056_v41 = vpop.permute.xlu0 %1055  ;;  %2071 = vmatprep.subr.bf16.mxu1 %v2070_v36  ;;  %v2111_v24 = vpack.c.bf16 %v1604_v56, %v1599_v49 }
 0x305   :  { %1084 = vst.msk [vmem:[#allocation4 + $0x98] sm:$0xff] %vm1010_vm0, %v1056_v41  ;;  %2073 = vmatpush1.bf16.msra.mxu1 %v2072_v45 }
 0x306   :  { %2004 = vmatprep.subr.msk.mxu1 %vm1703_vm14, %v1686_v54 }
 0x307   :  { %v1180_v50 = vpop.permute.xlu1 %1179 }
 0x308   :  { %v2858_v44 = vsel %vm230_vm2, %v2741_v27, %v1180_v50  ;;  %v1124_v57 = vpop.permute.xlu0 %1123 }
 0x309   :  { %1152 = vst.msk [vmem:[#allocation4 + $0xe8] sm:$0xff] %vm1010_vm0, %v1124_v57  ;;  %2005 = vmatpush1.msk.msra.mxu1 %vm1703_vm14, %v1685_v55 }
 0x30a   :  { %2110 = vmatprep.subr.bf16.mxu1 %v2259_v53  ;;  %1784 = vmatmul.mubr.f32.vlgmr.msra.gmra.mrb[0].mxu1 %v2643_v58 }
 0x30b   :  { %v2864_v61 = vpop.permute.xlu1 %1247  ;;  %2112 = vmatpush1.bf16.msra.mxu1 %v2111_v24  ;;  %2011 = vmatprep.mubr.msk.f32.mxu1 %vm1700_vm10, %v2649_v59  ;;  %vm3027_vm10 = vmmov %vm3021_vm7 }
 0x30c   :  { %v2871_v27 = vsel %vm284_vm3, %v2752_v33, %v2864_v61  ;;  %v1192_v62 = vpop.permute.xlu0 %1191  ;;  %2113 = vmatprep.subr.bf16.mxu1 %v2259_v53  ;;  %vm3030_vm7 = vmmov %vm3024_vm11 }
 0x30d   :  { %1220 = vst.msk [vmem:[#allocation4 + $0x138] sm:$0xff] %vm1010_vm0, %v1192_v62  ;;  %vm3037_vm9 = vmmov %vm3030_vm7 }
 0x30e   :  { %vm3038_vm11 = vmmov %vm3030_vm7 }
 0x30f   :  { %v2875_v63 = vpop.permute.xlu1 %1315 }
 0x310   :  { %v2880_v1 = vsel %vm338_vm6, %v2763_v38, %v2875_v63  ;;  %v1260_v6 = vpop.permute.xlu0 %1259  ;;  %v1624_v49 = vld [vmem:[#allocation4 + $0xe8] sm:$0xff] }
 0x311   :  { %1288 = vst.msk [vmem:[#allocation4 + $0x188] sm:$0xff] %vm1010_vm0, %v1260_v6 }
 0x313   :  { %v2883_v59 = vpop.permute.xlu1 %1387 }
 0x314   :  { %v2888_v33 = vsel %vm3027_vm10, %v2772_v12, %v2883_v59  ;;  %v1328_v2 = vpop.permute.xlu0 %1327  ;;  %vm3041_vm10 = vmmov %vm3030_vm7 }
 0x315   :  { %1356 = vst.msk [vmem:[#allocation4 + $0x1d8] sm:$0xff] %vm1010_vm0, %v1328_v2 }
 0x317   :  { %v2891_v8 = vpop.permute.xlu1 %1465 }
 0x318   :  { %v2896_v38 = vsel %vm3028_vm15, %v2779_v40, %v2891_v8  ;;  %v1402_v10 = vpop.permute.xlu0 %1401  ;;  %vm3042_vm15 = vmmov %vm3030_vm7 }
 0x319   :  { %v1414_v14 = vsel %vm3029_vm1, %v1402_v10, %v2551_v30 }
 0x31a   :  { %1434 = vst.msk [vmem:[#allocation4 + $0x228] sm:$0xff] %vm1010_vm0, %v1414_v14  ;;  %v1634_v14 = vld [vmem:[#allocation4 + $0x138] sm:$0xff] }
 0x31b   :  { %v2901_v17 = vpop.permute.xlu1 %1543 }
 0x31c   :  { %v2906_v12 = vsel %vm3030_vm7, %v2785_v48, %v2901_v17  ;;  %v2908_v4 = vpop.permute.xlu0 %1479 }
 0x31f   :  { %v1054_v18 = vpop.permute.xlu1 %1053 }
 0x320   :  { %v1063_v40 = vsel %vm119_vm5, %v2793_v47, %v1054_v18  ;;  %v1064_v21 = vsel %vm119_vm5, %v1054_v18, %v1056_v41  ;;  %v2913_v22 = vpop.permute.xlu0 %1557 }
 0x321   :  { %v2080_v9 = vpack.c.bf16 %v1063_v40, %v2839_v42  ;;  %v1614_v42 = vld [vmem:[#allocation4 + $0x98] sm:$0xff] }
 0x323   :  { %v1122_v30 = vpop.permute.xlu1 %1121 }
 0x324   :  { %v1131_v7 = vsel %vm174_vm4, %v2799_v60, %v1122_v30  ;;  %v1132_v23 = vsel %vm174_vm4, %v1122_v30, %v1124_v57  ;;  %v1046_v26 = vpop.permute.xlu0 %1045 }
 0x325   :  { %v1060_v48 = vsel %vm119_vm5, %v1044_v46, %v1046_v26  ;;  %1079 = vst.msk [vmem:[#allocation4 + $0x70] sm:$0xff] %vm1010_vm0, %v1046_v26  ;;  %v2084_v11 = vpack.c.bf16 %v1131_v7, %v2852_v20 }
 0x326   :  { %v2078_v28 = vpack.c.bf16 %v1064_v21, %v1060_v48 }
 0x327   :  { %v1190_v31 = vpop.permute.xlu1 %1189 }
 0x328   :  { %v1199_v47 = vsel %vm230_vm2, %v2805_v3, %v1190_v31  ;;  %v1200_v0 = vsel %vm230_vm2, %v1190_v31, %v1192_v62  ;;  %v1114_v35 = vpop.permute.xlu0 %1113  ;;  %2079 = vmatprep.subr.bf16.mxu0 %v2078_v28 }
 0x329   :  { %v1128_v60 = vsel %vm174_vm4, %v2846_v52, %v1114_v35  ;;  %1147 = vst.msk [vmem:[#allocation4 + $0xc0] sm:$0xff] %vm1010_vm0, %v1114_v35  ;;  %2081 = vmatpush1.bf16.msra.mxu0 %v2080_v9  ;;  %v2088_v54 = vpack.c.bf16 %v1199_v47, %v2858_v44  ;;  %vm3032_vm4 = vmmov %vm3029_vm1 }
 0x32a   :  { %v2082_v37 = vpack.c.bf16 %v1132_v23, %v1128_v60 }
 0x32b   :  { %v1258_v39 = vpop.permute.xlu1 %1257 }
 0x32c   :  { %v1267_v32 = vsel %vm284_vm3, %v2811_v15, %v1258_v39  ;;  %v1268_v46 = vsel %vm284_vm3, %v1258_v39, %v1260_v6  ;;  %v1182_v3 = vpop.permute.xlu0 %1181  ;;  %v1609_v13 = vld [vmem:[#allocation4 + $0x70] sm:$0xff]  ;;  %2083 = vmatprep.subr.bf16.mxu0 %v2082_v37 }
 0x32d   :  { %v1196_v16 = vsel %vm230_vm2, %v1180_v50, %v1182_v3  ;;  %1215 = vst.msk [vmem:[#allocation4 + $0x110] sm:$0xff] %vm1010_vm0, %v1182_v3  ;;  %v2114_v36 = vpack.c.bf16 %v1614_v42, %v1609_v13  ;;  %2085 = vmatpush1.bf16.msra.mxu0 %v2084_v11  ;;  %vm3031_vm2 = vmmov %vm3029_vm1 }
 0x32e   :  { %v2086_v52 = vpack.c.bf16 %v1200_v0, %v1196_v16 }
 0x32f   :  { %v1326_v45 = vpop.permute.xlu1 %1325  ;;  %2115 = vmatpush1.bf16.msra.mxu1 %v2114_v36 }
 0x330   :  { %v1335_v15 = vsel %vm338_vm6, %v2818_v25, %v1326_v45  ;;  %v1336_v20 = vsel %vm338_vm6, %v1326_v45, %v1328_v2  ;;  %v1250_v41 = vpop.permute.xlu0 %1249  ;;  %2116 = vmatprep.subr.bf16.mxu1 %v2259_v53  ;;  %v1619_v55 = vld [vmem:[#allocation4 + $0xc0] sm:$0xff]  ;;  %2087 = vmatprep.subr.bf16.mxu0 %v2086_v52  ;;  %v2092_v25 = vpack.c.bf16 %v1267_v32, %v2871_v27 }
 0x331   :  { %v1264_v56 = vsel %vm284_vm3, %v2864_v61, %v1250_v41  ;;  %1283 = vst.msk [vmem:[#allocation4 + $0x160] sm:$0xff] %vm1010_vm0, %v1250_v41  ;;  %v2117_v50 = vpack.c.bf16 %v1624_v49, %v1619_v55  ;;  %2089 = vmatpush1.bf16.msra.mxu0 %v2088_v54  ;;  %vm3033_vm3 = vmmov %vm3022_vm8  ;;  %v1689_v49 = vld [vmem:[#allocation4 + $0x2f0] sm:$0x1] }
 0x332   :  { %v2090_v57 = vpack.c.bf16 %v1268_v46, %v1264_v56  ;;  %vm3034_vm5 = vmmov %vm3033_vm3 }
 0x333   :  { %v1400_v44 = vpop.permute.xlu1 %1399  ;;  %2118 = vmatpush1.bf16.msra.mxu1 %v2117_v50  ;;  %vm3036_vm8 = vmmov %vm3029_vm1 }
 0x334   :  { %v1412_v24 = vsel %vm3031_vm2, %v2825_v34, %v1400_v44  ;;  %v1413_v62 = vsel %vm3032_vm4, %v1400_v44, %v1402_v10  ;;  %v1318_v6 = vpop.permute.xlu0 %1317  ;;  %2119 = vmatprep.subr.bf16.mxu1 %v2259_v53  ;;  %v1629_v2 = vld [vmem:[#allocation4 + $0x110] sm:$0xff]  ;;  %2091 = vmatprep.subr.bf16.mxu0 %v2090_v57  ;;  %v2096_v34 = vpack.c.bf16 %v1335_v15, %v2880_v1  ;;  %vm3039_vm12 = vmmov %vm3033_vm3 }
 0x335   :  { %v1332_v61 = vsel %vm338_vm6, %v2875_v63, %v1318_v6  ;;  %1351 = vst.msk [vmem:[#allocation4 + $0x1b0] sm:$0xff] %vm1010_vm0, %v1318_v6  ;;  %v2120_v18 = vpack.c.bf16 %v1634_v14, %v1629_v2  ;;  %2093 = vmatpush1.bf16.msra.mxu0 %v2092_v25  ;;  %v1644_v63 = vld [vmem:[#allocation4 + $0x188] sm:$0xff]  ;;  %vm3035_vm6 = vmmov %vm3029_vm1  ;;  %v2100_v28 = vpack.c.bf16 %v1412_v24, %v2888_v33 }
 0x336   :  { %v2094_v40 = vpack.c.bf16 %v1336_v20, %v1332_v61  ;;  %vm3040_vm13 = vmmov %vm3033_vm3 }
 0x337   :  { %v1478_v27 = vpop.permute.xlu1 %1477  ;;  %2121 = vmatpush1.bf16.msra.mxu1 %v2120_v18  ;;  %vm3043_vm1 = vmmov %vm3033_vm3 }
 0x338   :  { %v1490_v10 = vsel %vm3033_vm3, %v2832_v43, %v1478_v27  ;;  %v1491_v21 = vsel %vm3034_vm5, %v1478_v27, %v2908_v4  ;;  %v1390_v30 = vpop.permute.xlu0 %1389  ;;  %2122 = vmatprep.subr.bf16.mxu1 %v2259_v53  ;;  %v1639_v7 = vld [vmem:[#allocation4 + $0x160] sm:$0xff]  ;;  %2095 = vmatprep.subr.bf16.mxu0 %v2094_v40 }
 0x339   :  { %v1408_v23 = vsel %vm3035_vm6, %v2883_v59, %v1390_v30  ;;  %v1409_v26 = vsel %vm3036_vm8, %v1390_v30, %v2549_v29  ;;  %v2123_v48 = vpack.c.bf16 %v1644_v63, %v1639_v7  ;;  %2097 = vmatpush1.bf16.msra.mxu0 %v2096_v34  ;;  %v1654_v29 = vld [vmem:[#allocation4 + $0x1d8] sm:$0xff]  ;;  %v2104_v33 = vpack.c.bf16 %v1490_v10, %v2896_v38  ;;  %v1688_v38 = vld [vmem:[#allocation4 + $0x2e8] sm:$0x1] }
 0x33a   :  { %1429 = vst.msk [vmem:[#allocation4 + $0x200] sm:$0xff] %vm1010_vm0, %v1409_v26  ;;  %v2098_v43 = vpack.c.bf16 %v1413_v62, %v1408_v23 }
 0x33b   :  { %v1556_v1 = vpop.permute.xlu1 %1555  ;;  %2124 = vmatpush1.bf16.msra.mxu1 %v2123_v48 }
 0x33c   :  { %v1568_v31 = vsel %vm3037_vm9, %v2841_v51, %v1556_v1  ;;  %v1569_v9 = vsel %vm3038_vm11, %v1556_v1, %v2913_v22  ;;  %v1468_v47 = vpop.permute.xlu0 %1467  ;;  %2125 = vmatprep.subr.bf16.mxu1 %v2259_v53  ;;  %v1649_v59 = vld [vmem:[#allocation4 + $0x1b0] sm:$0xff]  ;;  %2099 = vmatprep.subr.bf16.mxu0 %v2098_v43 }
 0x33d   :  { %v1486_v0 = vsel %vm3039_vm12, %v2891_v8, %v1468_v47  ;;  %v2126_v35 = vpack.c.bf16 %v1654_v29, %v1649_v59  ;;  %2101 = vmatpush1.bf16.msra.mxu0 %v2100_v28  ;;  %v1664_v8 = vld [vmem:[#allocation4 + $0x228] sm:$0xff]  ;;  %v2108_v42 = vpack.c.bf16 %v1568_v31, %v2906_v12 }
 0x33e   :  { %v2102_v60 = vpack.c.bf16 %v1491_v21, %v1486_v0 }
 0x33f   :  { %v1470_v37 = vpop.permute.xlu1 %1469  ;;  %2127 = vmatpush1.bf16.msra.mxu1 %v2126_v35 }
 0x340   :  { %v1487_v51 = vsel %vm3040_vm13, %v1468_v47, %v1470_v37  ;;  %v1546_v39 = vpop.permute.xlu0 %1545  ;;  %2128 = vmatprep.subr.bf16.mxu1 %v2259_v53  ;;  %2103 = vmatprep.subr.bf16.mxu0 %v2102_v60 }
 0x341   :  { %1507 = vst.msk [vmem:[#allocation4 + $0x250] sm:$0xff] %vm1010_vm0, %v1487_v51  ;;  %v1564_v11 = vsel %vm3041_vm10, %v2901_v17, %v1546_v39  ;;  %v1659_v32 = vld [vmem:[#allocation4 + $0x200] sm:$0xff]  ;;  %2105 = vmatpush1.bf16.msra.mxu0 %v2104_v33 }
 0x342   :  { %v2129_v46 = vpack.c.bf16 %v1664_v8, %v1659_v32  ;;  %v2106_v3 = vpack.c.bf16 %v1569_v9, %v1564_v11  ;;  %v1687_v17 = vld [vmem:[#allocation4 + $0x2e0] sm:$0x1] }
 0x343   :  { %v1548_v13 = vpop.permute.xlu1 %1547 }
 0x344   :  { %v1565_v16 = vsel %vm3042_vm15, %v1546_v39, %v1548_v13  ;;  %2130 = vmatpush1.bf16.msra.mxu1 %v2129_v46  ;;  %v1482_v36 = vpop.permute.xlu0 %1481  ;;  %2107 = vmatprep.subr.bf16.mxu0 %v2106_v3 }
 0x345   :  { %1585 = vst.msk [vmem:[#allocation4 + $0x2a0] sm:$0xff] %vm1010_vm0, %v1565_v16  ;;  %v1492_v52 = vsel %vm3043_vm1, %v2908_v4, %v1482_v36  ;;  %2109 = vmatpush1.bf16.msra.mxu0 %v2108_v42  ;;  %2131 = vmatprep.subr.bf16.mxu1 %v2259_v53 }
 0x346   :  { %1512 = vst.msk [vmem:[#allocation4 + $0x278] sm:$0xff] %vm1010_vm0, %v1492_v52  ;;  %2007 = vmatprep.subr.msk.mxu0 %vm1703_vm14, %v1688_v38 }
 0x348   :  { %v1560_v12 = vpop.permute.xlu0 %1559  ;;  %v1669_v54 = vld [vmem:[#allocation4 + $0x250] sm:$0xff] }
 0x349   :  { %v1570_v45 = vsel %vm3030_vm7, %v2913_v22, %v1560_v12  ;;  %2008 = vmatpush1.msk.msra.mxu0 %vm1703_vm14, %v1687_v17 }
 0x34a   :  { %1590 = vst.msk [vmem:[#allocation4 + $0x2c8] sm:$0xff] %vm1010_vm0, %v1570_v45  ;;  %1855 = vmatmul.mubr.f32.vlgmr.msra.gmra.mrb[10].mxu0 %v2643_v58  ;;  %vm3044_vm0 = vcmask 517120  }
 0x34c   :  { %v1679_v20 = vld [vmem:[#allocation4 + $0x2a0] sm:$0xff] }
 0x34d   :  { %v1674_v4 = vld [vmem:[#allocation4 + $0x278] sm:$0xff] }
 0x34e   :  { %v2132_v15 = vpack.c.bf16 %v1674_v4, %v1669_v54 }
 0x350   :  { %2133 = vmatpush1.bf16.msra.mxu1 %v2132_v15 }
 0x351   :  { %2134 = vmatprep.subr.bf16.mxu1 %v2259_v53  ;;  %v1684_v41 = vld [vmem:[#allocation4 + $0x2c8] sm:$0xff] }
 0x352   :  { %v2135_v55 = vpack.c.bf16 %v1684_v41, %v1679_v20 }
 0x354   :  { %2136 = vmatpush1.bf16.msra.mxu1 %v2135_v55 }
 0x355   :  { %1897 = vmatprep.subr.mxu1 %v2257_v19 }
 0x358   :  { %2010 = vmatpush1.msk.msra.mxu1 %vm1703_vm14, %v1689_v49 }
 0x359   :  { %1926 = vmatmul.mubr.f32.vlgmr.msra.gmra.mrb[2].mxu1 %v2643_v58 }
 0x3dd   :  { %v1785_v22 = vpop.f32.mrb[0].mxu1 }
 0x3de   :  { %v1787_v56 = vpop.f32.mrb[1].mxu1 }
 0x3df   :  { %v1936_v50 = vcombine.low %v1785_v22, %v1787_v56 }
 0x3e1   :  { %v1944_v24 = vrot.slane %v1936_v50, %v2313_v5 }
 0x41d   :  { %v1856_v57 = vpop.f32.mrb[10].mxu0 }
 0x41e   :  { %v1858_v44 = vpop.f32.mrb[11].mxu0 }
 0x41f   :  { %v1937_v25 = vcombine.low %v1856_v57, %v1858_v44 }
 0x421   :  { %v1951_v53 = vrot.slane %v1937_v25, %v2313_v5 }
 0x423   :  { %v1952_v62 = vcombine.low %v1944_v24, %v1951_v53 }
 0x425   :  { %1962 = vst [vmem:[#allocation10] sm:$0xff] %v1952_v62 }
 0x42c   :  { %v1927_v19 = vpop.f32.mrb[2].mxu1 }
 0x42d   :  { %v1959_v6 = vrot.slane %v1927_v19, %v2313_v5  ;;  %v1929_v2 = vpop.f32.mrb[3].mxu1 }
 0x42f   :  { %1963 = vst.msk [vmem:[#allocation10 + $0x8] sm:$0x3] %vm3044_vm0, %v1959_v6 }
 0x430   :  { %2226 = shalt.err (!%p2223_p6)
}
 0x431   :  { %s2227_s24 = scalar_lea.hbm %s3010_s3, 160 }
 0x432   :  { %p2228_p7 = scmp.ne.s32.totalorder %s3010_s3, %s2227_s24  ;;  %p2231_p8 = scmp.lt.u32.totalorder %s2227_s24, %s3010_s3 }
 0x434   :  { %p2233_p9 = pnand %p2231_p8, %p2228_p7 }
 0x436   :  { %2236 = shalt.err (!%p2233_p9)
}
 0x437   :  { %1973 = dma.vmem_to_hbm [thread:$0]  %s1971_s20, 160, %s3010_s3, [#allocation7]  }
 0x438   :  { %2241 = dma.done.wait [#allocation7], 160  }
 0x439   :  { %2242 = vsyncadd [#allocation7], 4294967136 }
 0x43a   :  { %1977 = vsyncpa [#allocation6], 1 }
 0x43b   :  { %1978 = vsyncpa [#allocation9], 1 }
 0x43c   :  { %1979 = vsyncpa [#allocation7], 1 }

</bundles_post_ra>
